<compile_context>
chip_gen: v7x
topology: tpu7x:2x2x1
jax: 0.10.0
libtpu: 0.0.40
codegen_flags: <defaults>
</compile_context>

<pallas_src>
import jax
import jax.numpy as jnp
from jax.experimental import pallas as pl
from jax.experimental.pallas import tpu as pltpu


_VMEM_LIMIT = 32 * 1024 * 1024   # below v7x's 64 MiB physical per-core VMEM


# ------------------------------ fused kernel --------------------------------

def _down_kernel(x_ref, sel_ref, w1_ref, b1_ref, w2_ref, b2_ref, o_ref,
                 xpad_ref, mid_ref, xk1_ref, xk2_ref):
    # Per grid step (= one image):
    #   x_ref   : (1, Cin, Hp, 2*W)  row pairs: [row 2r | row 2r+1] on lanes
    #   sel_ref : (W, 2*Wp)          0/1 selection (even cols | odd cols)
    #   w1_ref  : (Cout, 9*Cin)      conv1 weights, tap-major, BN1 scale folded
    #   b1_ref  : (Cout, 1)          conv1 bias + BN1 shift
    #   w2_ref  : (Cout, 9*Cout)     conv2 weights, BN2 folded
    #   b2_ref  : (Cout, 1)
    #   o_ref   : (1, Cout, Hp, Wp)  NCHW output block
    #   xpad_ref: (Cin,  Mp)         zero-padded pooled image, spatial flat
    #   mid_ref : (Cout, Mp)         zero-padded conv1 activation, spatial flat
    #   xk1_ref : (9*Cin,  n_out)    staged conv1 taps
    #   xk2_ref : (9*Cout, n_out)    staged conv2 taps
    _, cin, hp, w2x = x_ref.shape
    w_img = w2x // 2
    _, cout, _, wp = o_ref.shape
    wt = wp + 2                        # padded row width (left + right zero col)
    n_out = hp * wt                    # flat output incl. 2 junk cols per row
    offs = tuple(dy * wt + dx for dy in range(3) for dx in range(3))

    # Zero the padded scratches: every position not written below is the
    # conv zero-padding border (scratch persists across grid steps).
    xpad_ref[...] = jnp.zeros_like(xpad_ref)
    mid_ref[...] = jnp.zeros_like(mid_ref)

    # ---- MaxPool2d(2): row-pair max + column-pair max, written straight into
    # the padded flat image (interior row r starts at flat (r+1)*wt + 1). ----
    sel = sel_ref[...]
    for r in range(hp):
        rows = x_ref[0, :, r, :]                                # (Cin, 2W)
        rmax = jnp.maximum(rows[:, :w_img], rows[:, w_img:])    # (Cin, W)
        z = jnp.dot(rmax, sel, preferred_element_type=jnp.float32)  # (Cin, 2Wp)
        pooled = jnp.maximum(z[:, :wp], z[:, wp:])              # (Cin, Wp)
        xpad_ref[:, pl.ds((r + 1) * wt + 1, wp)] = pooled

    # ---- conv1 + BN1 + ReLU: stage 9 shifted taps, one K=9*Cin MXU dot. ----
    for k, off in enumerate(offs):
        xk1_ref[pl.ds(k * cin, cin), :] = xpad_ref[:, pl.ds(off, n_out)]
    y1 = jnp.dot(w1_ref[...], xk1_ref[...], preferred_element_type=jnp.float32)
    y1 = jnp.maximum(y1 + b1_ref[...], 0.0)                     # (Cout, n_out)
    # Copy only the valid Wp columns of each row into the next padded image:
    # junk columns are never propagated and the zero border stays intact.
    for r in range(hp):
        mid_ref[:, pl.ds((r + 1) * wt + 1, wp)] = y1[:, r * wt:r * wt + wp]

    # ---- conv2 + BN2 + ReLU ----
    for k, off in enumerate(offs):
        xk2_ref[pl.ds(k * cout, cout), :] = mid_ref[:, pl.ds(off, n_out)]
    y2 = jnp.dot(w2_ref[...], xk2_ref[...], preferred_element_type=jnp.float32)
    y2 = jnp.maximum(y2 + b2_ref[...], 0.0)                     # (Cout, n_out)

    # ---- store valid columns directly as NCHW ----
    for r in range(hp):
        o_ref[0, :, r, :] = y2[:, r * wt:r * wt + wp].astype(o_ref.dtype)


# -------------------------------- wrapper ------------------------------------

def _fold_bn(w_oihw, b, gamma, beta, mean, var, eps=1e-5):
    """Fold eval-mode BN into the conv: returns (Cout, 9*Cin) weights (tap-major)
    and a (Cout, 1) bias."""
    cout, cin = w_oihw.shape[0], w_oihw.shape[1]
    scale = gamma / jnp.sqrt(var + eps)
    wmat = jnp.transpose(w_oihw, (0, 2, 3, 1)).reshape(cout, 9 * cin)
    wmat = (wmat * scale[:, None]).astype(jnp.float32)
    bias = (((b - mean) * scale + beta).reshape(cout, 1)).astype(jnp.float32)
    return wmat, bias


def down_forward(x_nchw, p):
    B, Cin, H, W = x_nchw.shape
    assert H % 2 == 0 and W % 2 == 0, "MaxPool2d(2) expects even spatial dims"
    Hp, Wp = H // 2, W // 2
    Wt, Ht = Wp + 2, Hp + 3            # +1 top, +2 bottom rows keep tap reads in bounds
    Mp = Ht * Wt
    n_out = Hp * Wt
    Cout = p["w1_oihw"].shape[0]

    w1, b1 = _fold_bn(p["w1_oihw"], p["b1"], p["g1"], p["beta1"], p["m1"], p["v1"])
    w2, b2 = _fold_bn(p["w2_oihw"], p["b2"], p["g2"], p["beta2"], p["m2"], p["v2"])

    # 0/1 selection matrix for the pooling column-pair compaction:
    # output col c (< Wp) picks source lane 2c (even), col Wp+c picks 2c+1.
    src = jnp.arange(W)
    dst = jnp.where(src % 2 == 0, src // 2, Wp + src // 2)
    sel = jax.nn.one_hot(dst, 2 * Wp, dtype=jnp.float32)         # (W, 2*Wp)

    # Free, contiguity-preserving reshape of NCHW (no transpose / extra pass):
    # row pairs end up side by side on the lane dim.
    x_r = x_nchw.reshape(B, Cin, Hp, 2 * W)

    out = pl.pallas_call(
        _down_kernel,
        out_shape=jax.ShapeDtypeStruct((B, Cout, Hp, Wp), x_nchw.dtype),
        grid=(B,),
        in_specs=[
            pl.BlockSpec((1, Cin, Hp, 2 * W), lambda b: (b, 0, 0, 0)),
            pl.BlockSpec((W, 2 * Wp), lambda b: (0, 0)),
            pl.BlockSpec((Cout, 9 * Cin), lambda b: (0, 0)),
            pl.BlockSpec((Cout, 1), lambda b: (0, 0)),
            pl.BlockSpec((Cout, 9 * Cout), lambda b: (0, 0)),
            pl.BlockSpec((Cout, 1), lambda b: (0, 0)),
        ],
        out_specs=pl.BlockSpec((1, Cout, Hp, Wp), lambda b: (b, 0, 0, 0)),
        scratch_shapes=[
            pltpu.VMEM((Cin, Mp), jnp.float32),
            pltpu.VMEM((Cout, Mp), jnp.float32),
            pltpu.VMEM((9 * Cin, n_out), jnp.float32),
            pltpu.VMEM((9 * Cout, n_out), jnp.float32),
        ],
        compiler_params=pltpu.CompilerParams(
            dimension_semantics=("parallel",),
            vmem_limit_bytes=_VMEM_LIMIT),
    )(x_r, sel, w1, b1, w2, b2)
    return out                                                    # NCHW


# ----------------------------- parameter init --------------------------------

def init_params(key, in_ch, out_ch):
    ks = jax.random.split(key, 12)

    def he(k, shape, fan_in):
        return jax.random.normal(k, shape, jnp.float32) * jnp.sqrt(2.0 / fan_in)

    p = {
        "w1_oihw": he(ks[0], (out_ch, in_ch, 3, 3), in_ch * 9),
        "w2_oihw": he(ks[1], (out_ch, out_ch, 3, 3), out_ch * 9),
        "b1": 0.1 * jax.random.normal(ks[2], (out_ch,), jnp.float32),
        "b2": 0.1 * jax.random.normal(ks[3], (out_ch,), jnp.float32),
        # BatchNorm (eval mode): gamma, beta, running_mean, running_var
        "g1": 1.0 + 0.1 * jax.random.normal(ks[4], (out_ch,), jnp.float32),
        "beta1": 0.1 * jax.random.normal(ks[5], (out_ch,), jnp.float32),
        "m1": 0.1 * jax.random.normal(ks[6], (out_ch,), jnp.float32),
        "v1": jax.random.uniform(ks[7], (out_ch,), jnp.float32, 0.5, 1.5),
        "g2": 1.0 + 0.1 * jax.random.normal(ks[8], (out_ch,), jnp.float32),
        "beta2": 0.1 * jax.random.normal(ks[9], (out_ch,), jnp.float32),
        "m2": 0.1 * jax.random.normal(ks[10], (out_ch,), jnp.float32),
        "v2": jax.random.uniform(ks[11], (out_ch,), jnp.float32, 0.5, 1.5),
    }
    return p


# ---------------------------- pure-JAX reference -----------------------------

def ref_forward(x_nchw, p, eps=1e-5):
    B, C, H, W = x_nchw.shape
    x = x_nchw.reshape(B, C, H // 2, 2, W // 2, 2).max(axis=(3, 5))

    def cbr(x, w_oihw, b, g, beta, m, v):
        y = jax.lax.conv_general_dilated(
            x, w_oihw, window_strides=(1, 1), padding=((1, 1), (1, 1)),
            dimension_numbers=("NCHW", "OIHW", "NCHW"),
            precision=jax.lax.Precision.HIGHEST)
        y = y + b[None, :, None, None]
        scale = (g / jnp.sqrt(v + eps))[None, :, None, None]
        y = (y - m[None, :, None, None]) * scale + beta[None, :, None, None]
        return jnp.maximum(y, 0.0)

    x = cbr(x, p["w1_oihw"], p["b1"], p["g1"], p["beta1"], p["m1"], p["v1"])
    x = cbr(x, p["w2_oihw"], p["b2"], p["g2"], p["beta2"], p["m2"], p["v2"])
    return x


# ----------------------------------- main -------------------------------------

if __name__ == "__main__":
    key = jax.random.PRNGKey(0)
    kx, kp = jax.random.split(key)
    in_ch, out_ch = 4, 8
    x = jax.random.normal(kx, (2, in_ch, 16, 16), jnp.float32)
    params = init_params(kp, in_ch, out_ch)

    fwd = jax.jit(down_forward)
    out = jax.block_until_ready(fwd(x, params))

    assert out.shape == (2, out_ch, 8, 8), out.shape
    ref = ref_forward(x, params)
    max_err = float(jnp.max(jnp.abs(out - ref)))
    assert max_err < 1e-2, f"max abs error too large: {max_err}"

    print("KERNEL_OK")
</pallas_src>

<mosaic_0001>
module attributes {stable_mosaic.version = 11 : i64} {
  func.func @_down_kernel(%arg0: i32, %arg1: memref<1x4x8x32xf32, #tpu.memory_space<vmem>>, %arg2: memref<16x16xf32, #tpu.memory_space<vmem>>, %arg3: memref<8x36xf32, #tpu.memory_space<vmem>>, %arg4: memref<8x1xf32, #tpu.memory_space<vmem>>, %arg5: memref<8x72xf32, #tpu.memory_space<vmem>>, %arg6: memref<8x1xf32, #tpu.memory_space<vmem>>, %arg7: memref<1x8x8x8xf32, #tpu.memory_space<vmem>>, %arg8: memref<4x110xf32, #tpu.memory_space<vmem>>, %arg9: memref<8x110xf32, #tpu.memory_space<vmem>>, %arg10: memref<36x80xf32, #tpu.memory_space<vmem>>, %arg11: memref<72x80xf32, #tpu.memory_space<vmem>>) attributes {dimension_semantics = [#tpu.dimension_semantics<parallel>], iteration_bounds = array<i64: 2>, scalar_prefetch = 0 : i64, scratch_operands = 4 : i64, tpu.core_type = #tpu.core_type<tc>, window_params = [{transform_indices = @transform_0, window_bounds = array<i64: 1, 4, 8, 32>}, {pipeline_mode = #tpu.pipeline_mode<synchronous>, transform_indices = @transform_1, window_bounds = array<i64: 16, 16>}, {pipeline_mode = #tpu.pipeline_mode<synchronous>, transform_indices = @transform_2, window_bounds = array<i64: 8, 36>}, {pipeline_mode = #tpu.pipeline_mode<synchronous>, transform_indices = @transform_3, window_bounds = array<i64: 8, 1>}, {pipeline_mode = #tpu.pipeline_mode<synchronous>, transform_indices = @transform_4, window_bounds = array<i64: 8, 72>}, {pipeline_mode = #tpu.pipeline_mode<synchronous>, transform_indices = @transform_5, window_bounds = array<i64: 8, 1>}, {transform_indices = @transform_6, window_bounds = array<i64: 1, 8, 8, 8>}]} {
    %cst = arith.constant 0.000000e+00 : f32
    %0 = vector.broadcast %cst : f32 to vector<4x110xf32>
    %c0 = arith.constant 0 : index
    %c0_0 = arith.constant 0 : index
    %1 = vector.load %arg8[%c0, %c0_0] : memref<4x110xf32, #tpu.memory_space<vmem>>, vector<4x110xf32>
    tpu.vector_store %arg8[%c0, %c0_0], %0 {strides = array<i32>} : memref<4x110xf32, #tpu.memory_space<vmem>>, vector<4x110xf32>,
    %cst_1 = arith.constant 0.000000e+00 : f32
    %2 = vector.broadcast %cst_1 : f32 to vector<8x110xf32>
    %c0_2 = arith.constant 0 : index
    %c0_3 = arith.constant 0 : index
    %3 = vector.load %arg9[%c0_2, %c0_3] : memref<8x110xf32, #tpu.memory_space<vmem>>, vector<8x110xf32>
    tpu.vector_store %arg9[%c0_2, %c0_3], %2 {strides = array<i32>} : memref<8x110xf32, #tpu.memory_space<vmem>>, vector<8x110xf32>,
    %c0_4 = arith.constant 0 : index
    %c0_5 = arith.constant 0 : index
    %4 = vector.load %arg2[%c0_4, %c0_5] : memref<16x16xf32, #tpu.memory_space<vmem>>, vector<16x16xf32>
    %c0_6 = arith.constant 0 : index
    %c0_7 = arith.constant 0 : index
    %c0_8 = arith.constant 0 : index
    %c0_9 = arith.constant 0 : index
    %5 = vector.load %arg1[%c0_6, %c0_7, %c0_8, %c0_9] : memref<1x4x8x32xf32, #tpu.memory_space<vmem>>, vector<1x4x1x32xf32>
    %6 = vector.shape_cast %5 : vector<1x4x1x32xf32> to vector<4x32xf32>
    %7 = vector.extract_strided_slice %6 {offsets = [0, 0], sizes = [4, 16], strides = [1, 1]} : vector<4x32xf32> to vector<4x16xf32>
    %8 = vector.extract_strided_slice %6 {offsets = [0, 16], sizes = [4, 16], strides = [1, 1]} : vector<4x32xf32> to vector<4x16xf32>
    %9 = arith.maximumf %7, %8 : vector<4x16xf32>
    %cst_10 = arith.constant dense<0.000000e+00> : vector<4x16xf32>
    %10 = tpu.matmul %9, %4, %cst_10 {dimension_numbers = #tpu.dot_dimension_numbers<[1], [0], [0], [1], [0, 0, 1, 1], [], []>} : vector<4x16xf32>, vector<16x16xf32>, vector<4x16xf32> -> vector<4x16xf32>
    %11 = vector.extract_strided_slice %10 {offsets = [0, 0], sizes = [4, 8], strides = [1, 1]} : vector<4x16xf32> to vector<4x8xf32>
    %12 = vector.extract_strided_slice %10 {offsets = [0, 8], sizes = [4, 8], strides = [1, 1]} : vector<4x16xf32> to vector<4x8xf32>
    %13 = arith.maximumf %11, %12 : vector<4x8xf32>
    %c0_11 = arith.constant 0 : index
    %c11 = arith.constant 11 : index
    %14 = vector.load %arg8[%c0_11, %c11] : memref<4x110xf32, #tpu.memory_space<vmem>>, vector<4x8xf32>
    tpu.vector_store %arg8[%c0_11, %c11], %13 {strides = array<i32>} : memref<4x110xf32, #tpu.memory_space<vmem>>, vector<4x8xf32>,
    %c0_12 = arith.constant 0 : index
    %c0_13 = arith.constant 0 : index
    %c1 = arith.constant 1 : index
    %c0_14 = arith.constant 0 : index
    %15 = vector.load %arg1[%c0_12, %c0_13, %c1, %c0_14] : memref<1x4x8x32xf32, #tpu.memory_space<vmem>>, vector<1x4x1x32xf32>
    %16 = vector.shape_cast %15 : vector<1x4x1x32xf32> to vector<4x32xf32>
    %17 = vector.extract_strided_slice %16 {offsets = [0, 0], sizes = [4, 16], strides = [1, 1]} : vector<4x32xf32> to vector<4x16xf32>
    %18 = vector.extract_strided_slice %16 {offsets = [0, 16], sizes = [4, 16], strides = [1, 1]} : vector<4x32xf32> to vector<4x16xf32>
    %19 = arith.maximumf %17, %18 : vector<4x16xf32>
    %cst_15 = arith.constant dense<0.000000e+00> : vector<4x16xf32>
    %20 = tpu.matmul %19, %4, %cst_15 {dimension_numbers = #tpu.dot_dimension_numbers<[1], [0], [0], [1], [0, 0, 1, 1], [], []>} : vector<4x16xf32>, vector<16x16xf32>, vector<4x16xf32> -> vector<4x16xf32>
    %21 = vector.extract_strided_slice %20 {offsets = [0, 0], sizes = [4, 8], strides = [1, 1]} : vector<4x16xf32> to vector<4x8xf32>
    %22 = vector.extract_strided_slice %20 {offsets = [0, 8], sizes = [4, 8], strides = [1, 1]} : vector<4x16xf32> to vector<4x8xf32>
    %23 = arith.maximumf %21, %22 : vector<4x8xf32>
    %c0_16 = arith.constant 0 : index
    %c21 = arith.constant 21 : index
    %24 = vector.load %arg8[%c0_16, %c21] : memref<4x110xf32, #tpu.memory_space<vmem>>, vector<4x8xf32>
    tpu.vector_store %arg8[%c0_16, %c21], %23 {strides = array<i32>} : memref<4x110xf32, #tpu.memory_space<vmem>>, vector<4x8xf32>,
    %c0_17 = arith.constant 0 : index
    %c0_18 = arith.constant 0 : index
    %c2 = arith.constant 2 : index
    %c0_19 = arith.constant 0 : index
    %25 = vector.load %arg1[%c0_17, %c0_18, %c2, %c0_19] : memref<1x4x8x32xf32, #tpu.memory_space<vmem>>, vector<1x4x1x32xf32>
    %26 = vector.shape_cast %25 : vector<1x4x1x32xf32> to vector<4x32xf32>
    %27 = vector.extract_strided_slice %26 {offsets = [0, 0], sizes = [4, 16], strides = [1, 1]} : vector<4x32xf32> to vector<4x16xf32>
    %28 = vector.extract_strided_slice %26 {offsets = [0, 16], sizes = [4, 16], strides = [1, 1]} : vector<4x32xf32> to vector<4x16xf32>
    %29 = arith.maximumf %27, %28 : vector<4x16xf32>
    %cst_20 = arith.constant dense<0.000000e+00> : vector<4x16xf32>
    %30 = tpu.matmul %29, %4, %cst_20 {dimension_numbers = #tpu.dot_dimension_numbers<[1], [0], [0], [1], [0, 0, 1, 1], [], []>} : vector<4x16xf32>, vector<16x16xf32>, vector<4x16xf32> -> vector<4x16xf32>
    %31 = vector.extract_strided_slice %30 {offsets = [0, 0], sizes = [4, 8], strides = [1, 1]} : vector<4x16xf32> to vector<4x8xf32>
    %32 = vector.extract_strided_slice %30 {offsets = [0, 8], sizes = [4, 8], strides = [1, 1]} : vector<4x16xf32> to vector<4x8xf32>
    %33 = arith.maximumf %31, %32 : vector<4x8xf32>
    %c0_21 = arith.constant 0 : index
    %c31 = arith.constant 31 : index
    %34 = vector.load %arg8[%c0_21, %c31] : memref<4x110xf32, #tpu.memory_space<vmem>>, vector<4x8xf32>
    tpu.vector_store %arg8[%c0_21, %c31], %33 {strides = array<i32>} : memref<4x110xf32, #tpu.memory_space<vmem>>, vector<4x8xf32>,
    %c0_22 = arith.constant 0 : index
    %c0_23 = arith.constant 0 : index
    %c3 = arith.constant 3 : index
    %c0_24 = arith.constant 0 : index
    %35 = vector.load %arg1[%c0_22, %c0_23, %c3, %c0_24] : memref<1x4x8x32xf32, #tpu.memory_space<vmem>>, vector<1x4x1x32xf32>
    %36 = vector.shape_cast %35 : vector<1x4x1x32xf32> to vector<4x32xf32>
    %37 = vector.extract_strided_slice %36 {offsets = [0, 0], sizes = [4, 16], strides = [1, 1]} : vector<4x32xf32> to vector<4x16xf32>
    %38 = vector.extract_strided_slice %36 {offsets = [0, 16], sizes = [4, 16], strides = [1, 1]} : vector<4x32xf32> to vector<4x16xf32>
    %39 = arith.maximumf %37, %38 : vector<4x16xf32>
    %cst_25 = arith.constant dense<0.000000e+00> : vector<4x16xf32>
    %40 = tpu.matmul %39, %4, %cst_25 {dimension_numbers = #tpu.dot_dimension_numbers<[1], [0], [0], [1], [0, 0, 1, 1], [], []>} : vector<4x16xf32>, vector<16x16xf32>, vector<4x16xf32> -> vector<4x16xf32>
    %41 = vector.extract_strided_slice %40 {offsets = [0, 0], sizes = [4, 8], strides = [1, 1]} : vector<4x16xf32> to vector<4x8xf32>
    %42 = vector.extract_strided_slice %40 {offsets = [0, 8], sizes = [4, 8], strides = [1, 1]} : vector<4x16xf32> to vector<4x8xf32>
    %43 = arith.maximumf %41, %42 : vector<4x8xf32>
    %c0_26 = arith.constant 0 : index
    %c41 = arith.constant 41 : index
    %44 = vector.load %arg8[%c0_26, %c41] : memref<4x110xf32, #tpu.memory_space<vmem>>, vector<4x8xf32>
    tpu.vector_store %arg8[%c0_26, %c41], %43 {strides = array<i32>} : memref<4x110xf32, #tpu.memory_space<vmem>>, vector<4x8xf32>,
    %c0_27 = arith.constant 0 : index
    %c0_28 = arith.constant 0 : index
    %c4 = arith.constant 4 : index
    %c0_29 = arith.constant 0 : index
    %45 = vector.load %arg1[%c0_27, %c0_28, %c4, %c0_29] : memref<1x4x8x32xf32, #tpu.memory_space<vmem>>, vector<1x4x1x32xf32>
    %46 = vector.shape_cast %45 : vector<1x4x1x32xf32> to vector<4x32xf32>
    %47 = vector.extract_strided_slice %46 {offsets = [0, 0], sizes = [4, 16], strides = [1, 1]} : vector<4x32xf32> to vector<4x16xf32>
    %48 = vector.extract_strided_slice %46 {offsets = [0, 16], sizes = [4, 16], strides = [1, 1]} : vector<4x32xf32> to vector<4x16xf32>
    %49 = arith.maximumf %47, %48 : vector<4x16xf32>
    %cst_30 = arith.constant dense<0.000000e+00> : vector<4x16xf32>
    %50 = tpu.matmul %49, %4, %cst_30 {dimension_numbers = #tpu.dot_dimension_numbers<[1], [0], [0], [1], [0, 0, 1, 1], [], []>} : vector<4x16xf32>, vector<16x16xf32>, vector<4x16xf32> -> vector<4x16xf32>
    %51 = vector.extract_strided_slice %50 {offsets = [0, 0], sizes = [4, 8], strides = [1, 1]} : vector<4x16xf32> to vector<4x8xf32>
    %52 = vector.extract_strided_slice %50 {offsets = [0, 8], sizes = [4, 8], strides = [1, 1]} : vector<4x16xf32> to vector<4x8xf32>
    %53 = arith.maximumf %51, %52 : vector<4x8xf32>
    %c0_31 = arith.constant 0 : index
    %c51 = arith.constant 51 : index
    %54 = vector.load %arg8[%c0_31, %c51] : memref<4x110xf32, #tpu.memory_space<vmem>>, vector<4x8xf32>
    tpu.vector_store %arg8[%c0_31, %c51], %53 {strides = array<i32>} : memref<4x110xf32, #tpu.memory_space<vmem>>, vector<4x8xf32>,
    %c0_32 = arith.constant 0 : index
    %c0_33 = arith.constant 0 : index
    %c5 = arith.constant 5 : index
    %c0_34 = arith.constant 0 : index
    %55 = vector.load %arg1[%c0_32, %c0_33, %c5, %c0_34] : memref<1x4x8x32xf32, #tpu.memory_space<vmem>>, vector<1x4x1x32xf32>
    %56 = vector.shape_cast %55 : vector<1x4x1x32xf32> to vector<4x32xf32>
    %57 = vector.extract_strided_slice %56 {offsets = [0, 0], sizes = [4, 16], strides = [1, 1]} : vector<4x32xf32> to vector<4x16xf32>
    %58 = vector.extract_strided_slice %56 {offsets = [0, 16], sizes = [4, 16], strides = [1, 1]} : vector<4x32xf32> to vector<4x16xf32>
    %59 = arith.maximumf %57, %58 : vector<4x16xf32>
    %cst_35 = arith.constant dense<0.000000e+00> : vector<4x16xf32>
    %60 = tpu.matmul %59, %4, %cst_35 {dimension_numbers = #tpu.dot_dimension_numbers<[1], [0], [0], [1], [0, 0, 1, 1], [], []>} : vector<4x16xf32>, vector<16x16xf32>, vector<4x16xf32> -> vector<4x16xf32>
    %61 = vector.extract_strided_slice %60 {offsets = [0, 0], sizes = [4, 8], strides = [1, 1]} : vector<4x16xf32> to vector<4x8xf32>
    %62 = vector.extract_strided_slice %60 {offsets = [0, 8], sizes = [4, 8], strides = [1, 1]} : vector<4x16xf32> to vector<4x8xf32>
    %63 = arith.maximumf %61, %62 : vector<4x8xf32>
    %c0_36 = arith.constant 0 : index
    %c61 = arith.constant 61 : index
    %64 = vector.load %arg8[%c0_36, %c61] : memref<4x110xf32, #tpu.memory_space<vmem>>, vector<4x8xf32>
    tpu.vector_store %arg8[%c0_36, %c61], %63 {strides = array<i32>} : memref<4x110xf32, #tpu.memory_space<vmem>>, vector<4x8xf32>,
    %c0_37 = arith.constant 0 : index
    %c0_38 = arith.constant 0 : index
    %c6 = arith.constant 6 : index
    %c0_39 = arith.constant 0 : index
    %65 = vector.load %arg1[%c0_37, %c0_38, %c6, %c0_39] : memref<1x4x8x32xf32, #tpu.memory_space<vmem>>, vector<1x4x1x32xf32>
    %66 = vector.shape_cast %65 : vector<1x4x1x32xf32> to vector<4x32xf32>
    %67 = vector.extract_strided_slice %66 {offsets = [0, 0], sizes = [4, 16], strides = [1, 1]} : vector<4x32xf32> to vector<4x16xf32>
    %68 = vector.extract_strided_slice %66 {offsets = [0, 16], sizes = [4, 16], strides = [1, 1]} : vector<4x32xf32> to vector<4x16xf32>
    %69 = arith.maximumf %67, %68 : vector<4x16xf32>
    %cst_40 = arith.constant dense<0.000000e+00> : vector<4x16xf32>
    %70 = tpu.matmul %69, %4, %cst_40 {dimension_numbers = #tpu.dot_dimension_numbers<[1], [0], [0], [1], [0, 0, 1, 1], [], []>} : vector<4x16xf32>, vector<16x16xf32>, vector<4x16xf32> -> vector<4x16xf32>
    %71 = vector.extract_strided_slice %70 {offsets = [0, 0], sizes = [4, 8], strides = [1, 1]} : vector<4x16xf32> to vector<4x8xf32>
    %72 = vector.extract_strided_slice %70 {offsets = [0, 8], sizes = [4, 8], strides = [1, 1]} : vector<4x16xf32> to vector<4x8xf32>
    %73 = arith.maximumf %71, %72 : vector<4x8xf32>
    %c0_41 = arith.constant 0 : index
    %c71 = arith.constant 71 : index
    %74 = vector.load %arg8[%c0_41, %c71] : memref<4x110xf32, #tpu.memory_space<vmem>>, vector<4x8xf32>
    tpu.vector_store %arg8[%c0_41, %c71], %73 {strides = array<i32>} : memref<4x110xf32, #tpu.memory_space<vmem>>, vector<4x8xf32>,
    %c0_42 = arith.constant 0 : index
    %c0_43 = arith.constant 0 : index
    %c7 = arith.constant 7 : index
    %c0_44 = arith.constant 0 : index
    %75 = vector.load %arg1[%c0_42, %c0_43, %c7, %c0_44] : memref<1x4x8x32xf32, #tpu.memory_space<vmem>>, vector<1x4x1x32xf32>
    %76 = vector.shape_cast %75 : vector<1x4x1x32xf32> to vector<4x32xf32>
    %77 = vector.extract_strided_slice %76 {offsets = [0, 0], sizes = [4, 16], strides = [1, 1]} : vector<4x32xf32> to vector<4x16xf32>
    %78 = vector.extract_strided_slice %76 {offsets = [0, 16], sizes = [4, 16], strides = [1, 1]} : vector<4x32xf32> to vector<4x16xf32>
    %79 = arith.maximumf %77, %78 : vector<4x16xf32>
    %cst_45 = arith.constant dense<0.000000e+00> : vector<4x16xf32>
    %80 = tpu.matmul %79, %4, %cst_45 {dimension_numbers = #tpu.dot_dimension_numbers<[1], [0], [0], [1], [0, 0, 1, 1], [], []>} : vector<4x16xf32>, vector<16x16xf32>, vector<4x16xf32> -> vector<4x16xf32>
    %81 = vector.extract_strided_slice %80 {offsets = [0, 0], sizes = [4, 8], strides = [1, 1]} : vector<4x16xf32> to vector<4x8xf32>
    %82 = vector.extract_strided_slice %80 {offsets = [0, 8], sizes = [4, 8], strides = [1, 1]} : vector<4x16xf32> to vector<4x8xf32>
    %83 = arith.maximumf %81, %82 : vector<4x8xf32>
    %c0_46 = arith.constant 0 : index
    %c81 = arith.constant 81 : index
    %84 = vector.load %arg8[%c0_46, %c81] : memref<4x110xf32, #tpu.memory_space<vmem>>, vector<4x8xf32>
    tpu.vector_store %arg8[%c0_46, %c81], %83 {strides = array<i32>} : memref<4x110xf32, #tpu.memory_space<vmem>>, vector<4x8xf32>,
    %c0_47 = arith.constant 0 : index
    %c0_48 = arith.constant 0 : index
    %85 = vector.load %arg8[%c0_47, %c0_48] : memref<4x110xf32, #tpu.memory_space<vmem>>, vector<4x80xf32>
    %c0_49 = arith.constant 0 : index
    %c0_50 = arith.constant 0 : index
    %86 = vector.load %arg10[%c0_49, %c0_50] : memref<36x80xf32, #tpu.memory_space<vmem>>, vector<4x80xf32>
    tpu.vector_store %arg10[%c0_49, %c0_50], %85 {strides = array<i32>} : memref<36x80xf32, #tpu.memory_space<vmem>>, vector<4x80xf32>,
    %c0_51 = arith.constant 0 : index
    %c1_52 = arith.constant 1 : index
    %87 = vector.load %arg8[%c0_51, %c1_52] : memref<4x110xf32, #tpu.memory_space<vmem>>, vector<4x80xf32>
    %c4_53 = arith.constant 4 : index
    %c0_54 = arith.constant 0 : index
    %88 = vector.load %arg10[%c4_53, %c0_54] : memref<36x80xf32, #tpu.memory_space<vmem>>, vector<4x80xf32>
    tpu.vector_store %arg10[%c4_53, %c0_54], %87 {strides = array<i32>} : memref<36x80xf32, #tpu.memory_space<vmem>>, vector<4x80xf32>,
    %c0_55 = arith.constant 0 : index
    %c2_56 = arith.constant 2 : index
    %89 = vector.load %arg8[%c0_55, %c2_56] : memref<4x110xf32, #tpu.memory_space<vmem>>, vector<4x80xf32>
    %c8 = arith.constant 8 : index
    %c0_57 = arith.constant 0 : index
    %90 = vector.load %arg10[%c8, %c0_57] : memref<36x80xf32, #tpu.memory_space<vmem>>, vector<4x80xf32>
    tpu.vector_store %arg10[%c8, %c0_57], %89 {strides = array<i32>} : memref<36x80xf32, #tpu.memory_space<vmem>>, vector<4x80xf32>,
    %c0_58 = arith.constant 0 : index
    %c10 = arith.constant 10 : index
    %91 = vector.load %arg8[%c0_58, %c10] : memref<4x110xf32, #tpu.memory_space<vmem>>, vector<4x80xf32>
    %c12 = arith.constant 12 : index
    %c0_59 = arith.constant 0 : index
    %92 = vector.load %arg10[%c12, %c0_59] : memref<36x80xf32, #tpu.memory_space<vmem>>, vector<4x80xf32>
    tpu.vector_store %arg10[%c12, %c0_59], %91 {strides = array<i32>} : memref<36x80xf32, #tpu.memory_space<vmem>>, vector<4x80xf32>,
    %c0_60 = arith.constant 0 : index
    %c11_61 = arith.constant 11 : index
    %93 = vector.load %arg8[%c0_60, %c11_61] : memref<4x110xf32, #tpu.memory_space<vmem>>, vector<4x80xf32>
    %c16 = arith.constant 16 : index
    %c0_62 = arith.constant 0 : index
    %94 = vector.load %arg10[%c16, %c0_62] : memref<36x80xf32, #tpu.memory_space<vmem>>, vector<4x80xf32>
    tpu.vector_store %arg10[%c16, %c0_62], %93 {strides = array<i32>} : memref<36x80xf32, #tpu.memory_space<vmem>>, vector<4x80xf32>,
    %c0_63 = arith.constant 0 : index
    %c12_64 = arith.constant 12 : index
    %95 = vector.load %arg8[%c0_63, %c12_64] : memref<4x110xf32, #tpu.memory_space<vmem>>, vector<4x80xf32>
    %c20 = arith.constant 20 : index
    %c0_65 = arith.constant 0 : index
    %96 = vector.load %arg10[%c20, %c0_65] : memref<36x80xf32, #tpu.memory_space<vmem>>, vector<4x80xf32>
    tpu.vector_store %arg10[%c20, %c0_65], %95 {strides = array<i32>} : memref<36x80xf32, #tpu.memory_space<vmem>>, vector<4x80xf32>,
    %c0_66 = arith.constant 0 : index
    %c20_67 = arith.constant 20 : index
    %97 = vector.load %arg8[%c0_66, %c20_67] : memref<4x110xf32, #tpu.memory_space<vmem>>, vector<4x80xf32>
    %c24 = arith.constant 24 : index
    %c0_68 = arith.constant 0 : index
    %98 = vector.load %arg10[%c24, %c0_68] : memref<36x80xf32, #tpu.memory_space<vmem>>, vector<4x80xf32>
    tpu.vector_store %arg10[%c24, %c0_68], %97 {strides = array<i32>} : memref<36x80xf32, #tpu.memory_space<vmem>>, vector<4x80xf32>,
    %c0_69 = arith.constant 0 : index
    %c21_70 = arith.constant 21 : index
    %99 = vector.load %arg8[%c0_69, %c21_70] : memref<4x110xf32, #tpu.memory_space<vmem>>, vector<4x80xf32>
    %c28 = arith.constant 28 : index
    %c0_71 = arith.constant 0 : index
    %100 = vector.load %arg10[%c28, %c0_71] : memref<36x80xf32, #tpu.memory_space<vmem>>, vector<4x80xf32>
    tpu.vector_store %arg10[%c28, %c0_71], %99 {strides = array<i32>} : memref<36x80xf32, #tpu.memory_space<vmem>>, vector<4x80xf32>,
    %c0_72 = arith.constant 0 : index
    %c22 = arith.constant 22 : index
    %101 = vector.load %arg8[%c0_72, %c22] : memref<4x110xf32, #tpu.memory_space<vmem>>, vector<4x80xf32>
    %c32 = arith.constant 32 : index
    %c0_73 = arith.constant 0 : index
    %102 = vector.load %arg10[%c32, %c0_73] : memref<36x80xf32, #tpu.memory_space<vmem>>, vector<4x80xf32>
    tpu.vector_store %arg10[%c32, %c0_73], %101 {strides = array<i32>} : memref<36x80xf32, #tpu.memory_space<vmem>>, vector<4x80xf32>,
    %c0_74 = arith.constant 0 : index
    %c0_75 = arith.constant 0 : index
    %103 = vector.load %arg3[%c0_74, %c0_75] : memref<8x36xf32, #tpu.memory_space<vmem>>, vector<8x36xf32>
    %c0_76 = arith.constant 0 : index
    %c0_77 = arith.constant 0 : index
    %104 = vector.load %arg10[%c0_76, %c0_77] : memref<36x80xf32, #tpu.memory_space<vmem>>, vector<36x80xf32>
    %cst_78 = arith.constant dense<0.000000e+00> : vector<8x80xf32>
    %105 = tpu.matmul %103, %104, %cst_78 {dimension_numbers = #tpu.dot_dimension_numbers<[1], [0], [0], [1], [0, 0, 1, 1], [], []>} : vector<8x36xf32>, vector<36x80xf32>, vector<8x80xf32> -> vector<8x80xf32>
    %c0_79 = arith.constant 0 : index
    %c0_80 = arith.constant 0 : index
    %106 = vector.load %arg4[%c0_79, %c0_80] : memref<8x1xf32, #tpu.memory_space<vmem>>, vector<8x1xf32>
    %107 = vector.broadcast %106 : vector<8x1xf32> to vector<8x80xf32>
    %108 = arith.addf %105, %107 : vector<8x80xf32>
    %cst_81 = arith.constant 0.000000e+00 : f32
    %109 = vector.broadcast %cst_81 : f32 to vector<8x80xf32>
    %110 = arith.maximumf %108, %109 : vector<8x80xf32>
    %111 = vector.extract_strided_slice %110 {offsets = [0, 0], sizes = [8, 8], strides = [1, 1]} : vector<8x80xf32> to vector<8x8xf32>
    %c0_82 = arith.constant 0 : index
    %c11_83 = arith.constant 11 : index
    %112 = vector.load %arg9[%c0_82, %c11_83] : memref<8x110xf32, #tpu.memory_space<vmem>>, vector<8x8xf32>
    tpu.vector_store %arg9[%c0_82, %c11_83], %111 {strides = array<i32>} : memref<8x110xf32, #tpu.memory_space<vmem>>, vector<8x8xf32>,
    %113 = vector.extract_strided_slice %110 {offsets = [0, 10], sizes = [8, 8], strides = [1, 1]} : vector<8x80xf32> to vector<8x8xf32>
    %c0_84 = arith.constant 0 : index
    %c21_85 = arith.constant 21 : index
    %114 = vector.load %arg9[%c0_84, %c21_85] : memref<8x110xf32, #tpu.memory_space<vmem>>, vector<8x8xf32>
    tpu.vector_store %arg9[%c0_84, %c21_85], %113 {strides = array<i32>} : memref<8x110xf32, #tpu.memory_space<vmem>>, vector<8x8xf32>,
    %115 = vector.extract_strided_slice %110 {offsets = [0, 20], sizes = [8, 8], strides = [1, 1]} : vector<8x80xf32> to vector<8x8xf32>
    %c0_86 = arith.constant 0 : index
    %c31_87 = arith.constant 31 : index
    %116 = vector.load %arg9[%c0_86, %c31_87] : memref<8x110xf32, #tpu.memory_space<vmem>>, vector<8x8xf32>
    tpu.vector_store %arg9[%c0_86, %c31_87], %115 {strides = array<i32>} : memref<8x110xf32, #tpu.memory_space<vmem>>, vector<8x8xf32>,
    %117 = vector.extract_strided_slice %110 {offsets = [0, 30], sizes = [8, 8], strides = [1, 1]} : vector<8x80xf32> to vector<8x8xf32>
    %c0_88 = arith.constant 0 : index
    %c41_89 = arith.constant 41 : index
    %118 = vector.load %arg9[%c0_88, %c41_89] : memref<8x110xf32, #tpu.memory_space<vmem>>, vector<8x8xf32>
    tpu.vector_store %arg9[%c0_88, %c41_89], %117 {strides = array<i32>} : memref<8x110xf32, #tpu.memory_space<vmem>>, vector<8x8xf32>,
    %119 = vector.extract_strided_slice %110 {offsets = [0, 40], sizes = [8, 8], strides = [1, 1]} : vector<8x80xf32> to vector<8x8xf32>
    %c0_90 = arith.constant 0 : index
    %c51_91 = arith.constant 51 : index
    %120 = vector.load %arg9[%c0_90, %c51_91] : memref<8x110xf32, #tpu.memory_space<vmem>>, vector<8x8xf32>
    tpu.vector_store %arg9[%c0_90, %c51_91], %119 {strides = array<i32>} : memref<8x110xf32, #tpu.memory_space<vmem>>, vector<8x8xf32>,
    %121 = vector.extract_strided_slice %110 {offsets = [0, 50], sizes = [8, 8], strides = [1, 1]} : vector<8x80xf32> to vector<8x8xf32>
    %c0_92 = arith.constant 0 : index
    %c61_93 = arith.constant 61 : index
    %122 = vector.load %arg9[%c0_92, %c61_93] : memref<8x110xf32, #tpu.memory_space<vmem>>, vector<8x8xf32>
    tpu.vector_store %arg9[%c0_92, %c61_93], %121 {strides = array<i32>} : memref<8x110xf32, #tpu.memory_space<vmem>>, vector<8x8xf32>,
    %123 = vector.extract_strided_slice %110 {offsets = [0, 60], sizes = [8, 8], strides = [1, 1]} : vector<8x80xf32> to vector<8x8xf32>
    %c0_94 = arith.constant 0 : index
    %c71_95 = arith.constant 71 : index
    %124 = vector.load %arg9[%c0_94, %c71_95] : memref<8x110xf32, #tpu.memory_space<vmem>>, vector<8x8xf32>
    tpu.vector_store %arg9[%c0_94, %c71_95], %123 {strides = array<i32>} : memref<8x110xf32, #tpu.memory_space<vmem>>, vector<8x8xf32>,
    %125 = vector.extract_strided_slice %110 {offsets = [0, 70], sizes = [8, 8], strides = [1, 1]} : vector<8x80xf32> to vector<8x8xf32>
    %c0_96 = arith.constant 0 : index
    %c81_97 = arith.constant 81 : index
    %126 = vector.load %arg9[%c0_96, %c81_97] : memref<8x110xf32, #tpu.memory_space<vmem>>, vector<8x8xf32>
    tpu.vector_store %arg9[%c0_96, %c81_97], %125 {strides = array<i32>} : memref<8x110xf32, #tpu.memory_space<vmem>>, vector<8x8xf32>,
    %c0_98 = arith.constant 0 : index
    %c0_99 = arith.constant 0 : index
    %127 = vector.load %arg9[%c0_98, %c0_99] : memref<8x110xf32, #tpu.memory_space<vmem>>, vector<8x80xf32>
    %c0_100 = arith.constant 0 : index
    %c0_101 = arith.constant 0 : index
    %128 = vector.load %arg11[%c0_100, %c0_101] : memref<72x80xf32, #tpu.memory_space<vmem>>, vector<8x80xf32>
    tpu.vector_store %arg11[%c0_100, %c0_101], %127 {strides = array<i32>} : memref<72x80xf32, #tpu.memory_space<vmem>>, vector<8x80xf32>,
    %c0_102 = arith.constant 0 : index
    %c1_103 = arith.constant 1 : index
    %129 = vector.load %arg9[%c0_102, %c1_103] : memref<8x110xf32, #tpu.memory_space<vmem>>, vector<8x80xf32>
    %c8_104 = arith.constant 8 : index
    %c0_105 = arith.constant 0 : index
    %130 = vector.load %arg11[%c8_104, %c0_105] : memref<72x80xf32, #tpu.memory_space<vmem>>, vector<8x80xf32>
    tpu.vector_store %arg11[%c8_104, %c0_105], %129 {strides = array<i32>} : memref<72x80xf32, #tpu.memory_space<vmem>>, vector<8x80xf32>,
    %c0_106 = arith.constant 0 : index
    %c2_107 = arith.constant 2 : index
    %131 = vector.load %arg9[%c0_106, %c2_107] : memref<8x110xf32, #tpu.memory_space<vmem>>, vector<8x80xf32>
    %c16_108 = arith.constant 16 : index
    %c0_109 = arith.constant 0 : index
    %132 = vector.load %arg11[%c16_108, %c0_109] : memref<72x80xf32, #tpu.memory_space<vmem>>, vector<8x80xf32>
    tpu.vector_store %arg11[%c16_108, %c0_109], %131 {strides = array<i32>} : memref<72x80xf32, #tpu.memory_space<vmem>>, vector<8x80xf32>,
    %c0_110 = arith.constant 0 : index
    %c10_111 = arith.constant 10 : index
    %133 = vector.load %arg9[%c0_110, %c10_111] : memref<8x110xf32, #tpu.memory_space<vmem>>, vector<8x80xf32>
    %c24_112 = arith.constant 24 : index
    %c0_113 = arith.constant 0 : index
    %134 = vector.load %arg11[%c24_112, %c0_113] : memref<72x80xf32, #tpu.memory_space<vmem>>, vector<8x80xf32>
    tpu.vector_store %arg11[%c24_112, %c0_113], %133 {strides = array<i32>} : memref<72x80xf32, #tpu.memory_space<vmem>>, vector<8x80xf32>,
    %c0_114 = arith.constant 0 : index
    %c11_115 = arith.constant 11 : index
    %135 = vector.load %arg9[%c0_114, %c11_115] : memref<8x110xf32, #tpu.memory_space<vmem>>, vector<8x80xf32>
    %c32_116 = arith.constant 32 : index
    %c0_117 = arith.constant 0 : index
    %136 = vector.load %arg11[%c32_116, %c0_117] : memref<72x80xf32, #tpu.memory_space<vmem>>, vector<8x80xf32>
    tpu.vector_store %arg11[%c32_116, %c0_117], %135 {strides = array<i32>} : memref<72x80xf32, #tpu.memory_space<vmem>>, vector<8x80xf32>,
    %c0_118 = arith.constant 0 : index
    %c12_119 = arith.constant 12 : index
    %137 = vector.load %arg9[%c0_118, %c12_119] : memref<8x110xf32, #tpu.memory_space<vmem>>, vector<8x80xf32>
    %c40 = arith.constant 40 : index
    %c0_120 = arith.constant 0 : index
    %138 = vector.load %arg11[%c40, %c0_120] : memref<72x80xf32, #tpu.memory_space<vmem>>, vector<8x80xf32>
    tpu.vector_store %arg11[%c40, %c0_120], %137 {strides = array<i32>} : memref<72x80xf32, #tpu.memory_space<vmem>>, vector<8x80xf32>,
    %c0_121 = arith.constant 0 : index
    %c20_122 = arith.constant 20 : index
    %139 = vector.load %arg9[%c0_121, %c20_122] : memref<8x110xf32, #tpu.memory_space<vmem>>, vector<8x80xf32>
    %c48 = arith.constant 48 : index
    %c0_123 = arith.constant 0 : index
    %140 = vector.load %arg11[%c48, %c0_123] : memref<72x80xf32, #tpu.memory_space<vmem>>, vector<8x80xf32>
    tpu.vector_store %arg11[%c48, %c0_123], %139 {strides = array<i32>} : memref<72x80xf32, #tpu.memory_space<vmem>>, vector<8x80xf32>,
    %c0_124 = arith.constant 0 : index
    %c21_125 = arith.constant 21 : index
    %141 = vector.load %arg9[%c0_124, %c21_125] : memref<8x110xf32, #tpu.memory_space<vmem>>, vector<8x80xf32>
    %c56 = arith.constant 56 : index
    %c0_126 = arith.constant 0 : index
    %142 = vector.load %arg11[%c56, %c0_126] : memref<72x80xf32, #tpu.memory_space<vmem>>, vector<8x80xf32>
    tpu.vector_store %arg11[%c56, %c0_126], %141 {strides = array<i32>} : memref<72x80xf32, #tpu.memory_space<vmem>>, vector<8x80xf32>,
    %c0_127 = arith.constant 0 : index
    %c22_128 = arith.constant 22 : index
    %143 = vector.load %arg9[%c0_127, %c22_128] : memref<8x110xf32, #tpu.memory_space<vmem>>, vector<8x80xf32>
    %c64 = arith.constant 64 : index
    %c0_129 = arith.constant 0 : index
    %144 = vector.load %arg11[%c64, %c0_129] : memref<72x80xf32, #tpu.memory_space<vmem>>, vector<8x80xf32>
    tpu.vector_store %arg11[%c64, %c0_129], %143 {strides = array<i32>} : memref<72x80xf32, #tpu.memory_space<vmem>>, vector<8x80xf32>,
    %c0_130 = arith.constant 0 : index
    %c0_131 = arith.constant 0 : index
    %145 = vector.load %arg5[%c0_130, %c0_131] : memref<8x72xf32, #tpu.memory_space<vmem>>, vector<8x72xf32>
    %c0_132 = arith.constant 0 : index
    %c0_133 = arith.constant 0 : index
    %146 = vector.load %arg11[%c0_132, %c0_133] : memref<72x80xf32, #tpu.memory_space<vmem>>, vector<72x80xf32>
    %cst_134 = arith.constant dense<0.000000e+00> : vector<8x80xf32>
    %147 = tpu.matmul %145, %146, %cst_134 {dimension_numbers = #tpu.dot_dimension_numbers<[1], [0], [0], [1], [0, 0, 1, 1], [], []>} : vector<8x72xf32>, vector<72x80xf32>, vector<8x80xf32> -> vector<8x80xf32>
    %c0_135 = arith.constant 0 : index
    %c0_136 = arith.constant 0 : index
    %148 = vector.load %arg6[%c0_135, %c0_136] : memref<8x1xf32, #tpu.memory_space<vmem>>, vector<8x1xf32>
    %149 = vector.broadcast %148 : vector<8x1xf32> to vector<8x80xf32>
    %150 = arith.addf %147, %149 : vector<8x80xf32>
    %cst_137 = arith.constant 0.000000e+00 : f32
    %151 = vector.broadcast %cst_137 : f32 to vector<8x80xf32>
    %152 = arith.maximumf %150, %151 : vector<8x80xf32>
    %153 = vector.extract_strided_slice %152 {offsets = [0, 0], sizes = [8, 8], strides = [1, 1]} : vector<8x80xf32> to vector<8x8xf32>
    %c0_138 = arith.constant 0 : index
    %c0_139 = arith.constant 0 : index
    %c0_140 = arith.constant 0 : index
    %c0_141 = arith.constant 0 : index
    %154 = vector.load %arg7[%c0_138, %c0_139, %c0_140, %c0_141] : memref<1x8x8x8xf32, #tpu.memory_space<vmem>>, vector<1x8x1x8xf32>
    %155 = vector.shape_cast %154 : vector<1x8x1x8xf32> to vector<8x8xf32>
    %156 = vector.shape_cast %153 : vector<8x8xf32> to vector<1x8x1x8xf32>
    tpu.vector_store %arg7[%c0_138, %c0_139, %c0_140, %c0_141], %156 {strides = array<i32>} : memref<1x8x8x8xf32, #tpu.memory_space<vmem>>, vector<1x8x1x8xf32>,
    %157 = vector.extract_strided_slice %152 {offsets = [0, 10], sizes = [8, 8], strides = [1, 1]} : vector<8x80xf32> to vector<8x8xf32>
    %c0_142 = arith.constant 0 : index
    %c0_143 = arith.constant 0 : index
    %c1_144 = arith.constant 1 : index
    %c0_145 = arith.constant 0 : index
    %158 = vector.load %arg7[%c0_142, %c0_143, %c1_144, %c0_145] : memref<1x8x8x8xf32, #tpu.memory_space<vmem>>, vector<1x8x1x8xf32>
    %159 = vector.shape_cast %158 : vector<1x8x1x8xf32> to vector<8x8xf32>
    %160 = vector.shape_cast %157 : vector<8x8xf32> to vector<1x8x1x8xf32>
    tpu.vector_store %arg7[%c0_142, %c0_143, %c1_144, %c0_145], %160 {strides = array<i32>} : memref<1x8x8x8xf32, #tpu.memory_space<vmem>>, vector<1x8x1x8xf32>,
    %161 = vector.extract_strided_slice %152 {offsets = [0, 20], sizes = [8, 8], strides = [1, 1]} : vector<8x80xf32> to vector<8x8xf32>
    %c0_146 = arith.constant 0 : index
    %c0_147 = arith.constant 0 : index
    %c2_148 = arith.constant 2 : index
    %c0_149 = arith.constant 0 : index
    %162 = vector.load %arg7[%c0_146, %c0_147, %c2_148, %c0_149] : memref<1x8x8x8xf32, #tpu.memory_space<vmem>>, vector<1x8x1x8xf32>
    %163 = vector.shape_cast %162 : vector<1x8x1x8xf32> to vector<8x8xf32>
    %164 = vector.shape_cast %161 : vector<8x8xf32> to vector<1x8x1x8xf32>
    tpu.vector_store %arg7[%c0_146, %c0_147, %c2_148, %c0_149], %164 {strides = array<i32>} : memref<1x8x8x8xf32, #tpu.memory_space<vmem>>, vector<1x8x1x8xf32>,
    %165 = vector.extract_strided_slice %152 {offsets = [0, 30], sizes = [8, 8], strides = [1, 1]} : vector<8x80xf32> to vector<8x8xf32>
    %c0_150 = arith.constant 0 : index
    %c0_151 = arith.constant 0 : index
    %c3_152 = arith.constant 3 : index
    %c0_153 = arith.constant 0 : index
    %166 = vector.load %arg7[%c0_150, %c0_151, %c3_152, %c0_153] : memref<1x8x8x8xf32, #tpu.memory_space<vmem>>, vector<1x8x1x8xf32>
    %167 = vector.shape_cast %166 : vector<1x8x1x8xf32> to vector<8x8xf32>
    %168 = vector.shape_cast %165 : vector<8x8xf32> to vector<1x8x1x8xf32>
    tpu.vector_store %arg7[%c0_150, %c0_151, %c3_152, %c0_153], %168 {strides = array<i32>} : memref<1x8x8x8xf32, #tpu.memory_space<vmem>>, vector<1x8x1x8xf32>,
    %169 = vector.extract_strided_slice %152 {offsets = [0, 40], sizes = [8, 8], strides = [1, 1]} : vector<8x80xf32> to vector<8x8xf32>
    %c0_154 = arith.constant 0 : index
    %c0_155 = arith.constant 0 : index
    %c4_156 = arith.constant 4 : index
    %c0_157 = arith.constant 0 : index
    %170 = vector.load %arg7[%c0_154, %c0_155, %c4_156, %c0_157] : memref<1x8x8x8xf32, #tpu.memory_space<vmem>>, vector<1x8x1x8xf32>
    %171 = vector.shape_cast %170 : vector<1x8x1x8xf32> to vector<8x8xf32>
    %172 = vector.shape_cast %169 : vector<8x8xf32> to vector<1x8x1x8xf32>
    tpu.vector_store %arg7[%c0_154, %c0_155, %c4_156, %c0_157], %172 {strides = array<i32>} : memref<1x8x8x8xf32, #tpu.memory_space<vmem>>, vector<1x8x1x8xf32>,
    %173 = vector.extract_strided_slice %152 {offsets = [0, 50], sizes = [8, 8], strides = [1, 1]} : vector<8x80xf32> to vector<8x8xf32>
    %c0_158 = arith.constant 0 : index
    %c0_159 = arith.constant 0 : index
    %c5_160 = arith.constant 5 : index
    %c0_161 = arith.constant 0 : index
    %174 = vector.load %arg7[%c0_158, %c0_159, %c5_160, %c0_161] : memref<1x8x8x8xf32, #tpu.memory_space<vmem>>, vector<1x8x1x8xf32>
    %175 = vector.shape_cast %174 : vector<1x8x1x8xf32> to vector<8x8xf32>
    %176 = vector.shape_cast %173 : vector<8x8xf32> to vector<1x8x1x8xf32>
    tpu.vector_store %arg7[%c0_158, %c0_159, %c5_160, %c0_161], %176 {strides = array<i32>} : memref<1x8x8x8xf32, #tpu.memory_space<vmem>>, vector<1x8x1x8xf32>,
    %177 = vector.extract_strided_slice %152 {offsets = [0, 60], sizes = [8, 8], strides = [1, 1]} : vector<8x80xf32> to vector<8x8xf32>
    %c0_162 = arith.constant 0 : index
    %c0_163 = arith.constant 0 : index
    %c6_164 = arith.constant 6 : index
    %c0_165 = arith.constant 0 : index
    %178 = vector.load %arg7[%c0_162, %c0_163, %c6_164, %c0_165] : memref<1x8x8x8xf32, #tpu.memory_space<vmem>>, vector<1x8x1x8xf32>
    %179 = vector.shape_cast %178 : vector<1x8x1x8xf32> to vector<8x8xf32>
    %180 = vector.shape_cast %177 : vector<8x8xf32> to vector<1x8x1x8xf32>
    tpu.vector_store %arg7[%c0_162, %c0_163, %c6_164, %c0_165], %180 {strides = array<i32>} : memref<1x8x8x8xf32, #tpu.memory_space<vmem>>, vector<1x8x1x8xf32>,
    %181 = vector.extract_strided_slice %152 {offsets = [0, 70], sizes = [8, 8], strides = [1, 1]} : vector<8x80xf32> to vector<8x8xf32>
    %c0_166 = arith.constant 0 : index
    %c0_167 = arith.constant 0 : index
    %c7_168 = arith.constant 7 : index
    %c0_169 = arith.constant 0 : index
    %182 = vector.load %arg7[%c0_166, %c0_167, %c7_168, %c0_169] : memref<1x8x8x8xf32, #tpu.memory_space<vmem>>, vector<1x8x1x8xf32>
    %183 = vector.shape_cast %182 : vector<1x8x1x8xf32> to vector<8x8xf32>
    %184 = vector.shape_cast %181 : vector<8x8xf32> to vector<1x8x1x8xf32>
    tpu.vector_store %arg7[%c0_166, %c0_167, %c7_168, %c0_169], %184 {strides = array<i32>} : memref<1x8x8x8xf32, #tpu.memory_space<vmem>>, vector<1x8x1x8xf32>,
    return
  }
  func.func @transform_0(%arg0: i32) -> (i32, i32, i32, i32) {
    %c0_i32 = arith.constant 0 : i32
    %c0_i32_0 = arith.constant 0 : i32
    %c0_i32_1 = arith.constant 0 : i32
    %c0_i32_2 = arith.constant 0 : i32
    return %arg0, %c0_i32, %c0_i32_0, %c0_i32_1 : i32, i32, i32, i32
  }
  func.func @transform_1(%arg0: i32) -> (i32, i32) {
    %c0_i32 = arith.constant 0 : i32
    %c0_i32_0 = arith.constant 0 : i32
    %c0_i32_1 = arith.constant 0 : i32
    return %c0_i32, %c0_i32_0 : i32, i32
  }
  func.func @transform_2(%arg0: i32) -> (i32, i32) {
    %c0_i32 = arith.constant 0 : i32
    %c0_i32_0 = arith.constant 0 : i32
    %c0_i32_1 = arith.constant 0 : i32
    return %c0_i32, %c0_i32_0 : i32, i32
  }
  func.func @transform_3(%arg0: i32) -> (i32, i32) {
    %c0_i32 = arith.constant 0 : i32
    %c0_i32_0 = arith.constant 0 : i32
    %c0_i32_1 = arith.constant 0 : i32
    return %c0_i32, %c0_i32_0 : i32, i32
  }
  func.func @transform_4(%arg0: i32) -> (i32, i32) {
    %c0_i32 = arith.constant 0 : i32
    %c0_i32_0 = arith.constant 0 : i32
    %c0_i32_1 = arith.constant 0 : i32
    return %c0_i32, %c0_i32_0 : i32, i32
  }
  func.func @transform_5(%arg0: i32) -> (i32, i32) {
    %c0_i32 = arith.constant 0 : i32
    %c0_i32_0 = arith.constant 0 : i32
    %c0_i32_1 = arith.constant 0 : i32
    return %c0_i32, %c0_i32_0 : i32, i32
  }
  func.func @transform_6(%arg0: i32) -> (i32, i32, i32, i32) {
    %c0_i32 = arith.constant 0 : i32
    %c0_i32_0 = arith.constant 0 : i32
    %c0_i32_1 = arith.constant 0 : i32
    %c0_i32_2 = arith.constant 0 : i32
    return %arg0, %c0_i32, %c0_i32_0, %c0_i32_1 : i32, i32, i32, i32
  }
}

</mosaic_0001>

<bundles_post_ra>
// kernel: down_forward.1
= control target key start
LH: loop header
LB: loop body
LE: loop exit
PB: predicated region body
PF: predicated region fallthrough
CT: control target
= control target key end

     0   :  { %11 = vsyncpa [#allocation7], 0  ;;  %s2928_s0 = inlined_call_operand.vmem [shape: f32[2,4,8,32], index: 0, kind: input, shape index: {}]   ;;  %s2929_s1 = inlined_call_operand.vmem [shape: f32[16,16], index: 1, kind: input, shape index: {}]   ;;  %s2930_s2 = inlined_call_operand.vmem [shape: f32[8,36], index: 2, kind: input, shape index: {}]   ;;  %s2931_s3 = inlined_call_operand.vmem [shape: f32[8,1], index: 3, kind: input, shape index: {}]   ;;  %s2932_s4 = inlined_call_operand.vmem [shape: f32[8,72], index: 4, kind: input, shape index: {}]   ;;  %s2933_s5 = inlined_call_operand.vmem [shape: f32[8,1], index: 5, kind: input, shape index: {}]   ;;  %s2934_s6 = inlined_call_operand.hbm [shape: f32[2,8,8,8], index: 6, kind: output, shape index: {}]  }
   0x1   :  { %13 = vsyncpa [#allocation7 + $0x1], 0  ;;  %s2297_s21 = smov 0   ;;  %s2299_s22 = smov 0  }
   0x2   :  { %s2301_s23 = smov 0   ;;  %s2303_s24 = smov 0  }
   0x3 LB: > { %s2318_s25 = sadd.s32 4294967295, %s2229_s24   ;;  %s1899_s26 = sadd.s32 4294967294, %s2229_s24   ;;  %s2229_s24 = sphi %s2303_s24, %s2940_s24   ;;  %s2225_s23 = sphi %s2301_s23, %s2939_s23   ;;  %s2221_s22 = sphi %s2299_s22, %s2938_s22   ;;  %s2217_s21 = sphi %s2297_s21, %s2937_s21  }
   0x4   : > { %s2322_s27 = sadd.s32 1, %s2229_s24   ;;  %s157_s28 = sadd.s32 1, %s2225_s23 }
   0x5   : > { %s154_s29 = ssub.s32 %s2229_s24, %s2322_s27  ;;  %p167_p0 = scmp.ne.s32.totalorder %s2225_s23, %s2221_s22 }
   0x6   : > { %p155_p1 = scmp.eq.s32.totalorder %s154_s29, 0  ;;  %p168_p2 = scmp.eq.s32.totalorder %s2318_s25, 1 }
   0x7   : > { %p173_p3 = scmp.ne.s32.totalorder %s2221_s22, %s2217_s21  ;;  %p174_p4 = scmp.eq.s32.totalorder %s1899_s26, 1 }
   0x8   : > { %s2333_s30 = scalar_select %p155_p1, %s2225_s23, %s157_s28  }
   0x9   : > { %p2335_p5 = por %p168_p2, %p167_p0  ;;  %p2339_p6 = por %p174_p4, %p173_p3 }
   0xa   : > { %p1902_p7 = scmp.ge.s32.totalorder %s2229_s24, 1  ;;  %p215_p8 = scmp.lt.s32.totalorder %s2229_s24, 3 }
   0xc   : > { %p216_p9 = pnand %p1902_p7, %p215_p8 }
   0xd   : > { %p245_p10 = scmp.lt.s32.totalorder (!%p216_p9), %s2318_s25, 1  ;;  %v254_v0 = vld [vmem:[%s2929_s1] sm:$0xff] (!%p216_p9)  ;;  %v255_v1 = vld [vmem:[%s2929_s1 + $0x8] sm:$0xff] (!%p216_p9)  ;;  %v2231_v2 = vmov (!%p216_p9), 0.0|0.0   ;;  %vm2232_vm0 = vmmov (!%p216_p9), 0   ;;  %v2233_v4 = vmov (!%p216_p9), 0.0  }
   0xe   : > { %219 = sbr.rel (%p216_p9) target bundleno = 1753 (0x6d9), region = 44  ;;  %2054 = vmatprep.subr.bf16.mxu0 (!%p216_p9), %v2231_v2  ;;  %v2353_v3 = vpack.c.bf16 (!%p216_p9), %v255_v1, %v254_v0  ;;  %2063 = vmatprep.subr.bf16.mxu1 (!%p216_p9), %v2231_v2  ;;  %s2234_s18 = smov (!%p216_p9), 112   ;;  %vm285_vm1 = vcmask (!%p216_p9), 1041409   ;;  %vm288_vm2 = vcmask (!%p216_p9), 1042434   ;;  %vm291_vm3 = vcmask (!%p216_p9), 1043459  }
   0xf   : > { %1968 = vmatprep.mubr.msk.f32.mxu0 (!%p216_p9), %vm2232_vm0, %v2233_v4  ;;  %1989 = vmatprep.mubr.msk.f32.mxu1 (!%p216_p9), %vm2232_vm0, %v2233_v4  ;;  %vm293_vm4 = vcmask (!%p216_p9), 130048   ;;  %s2235_s19 = smov (!%p216_p9), 120   ;;  %vm250_vm5 = vcmask (!%p216_p9), 896000   ;;  %s2236_s20 = smov (!%p216_p9), 11   ;;  %vm375_vm6 = vcmask (!%p216_p9), 150616   ;;  %vm492_vm7 = vcmask (!%p216_p9), 232616  }
  0x10   : > { %2056 = vmatpush3.bf16.msra.mxu0 (!%p216_p9), %v2353_v3  ;;  %2065 = vmatpush3.bf16.msra.mxu1 (!%p216_p9), %v2353_v3  ;;  %251 = vst.msk [vmem:[#allocation2] sm:$0xf] (!%p216_p9), %vm250_vm5, %v2233_v4  ;;  %s2237_s26 = smov (!%p216_p9), 31   ;;  %s2238_s28 = smov (!%p216_p9), 41   ;;  %vm609_vm8 = vcmask (!%p216_p9), 314616   ;;  %vm726_vm9 = vcmask (!%p216_p9), 396616  }
  0x11   : > { %2057 = vmatprep.subr.bf16.mxu0 (!%p216_p9), %v2231_v2  ;;  %2069 = vmatprep.subr.bf16.mxu1 (!%p216_p9), %v2231_v2  ;;  %s2239_s29 = smov (!%p216_p9), 21   ;;  %s2240_s9 = smov (!%p216_p9), 51   ;;  %vm843_vm10 = vcmask (!%p216_p9), 478616   ;;  %vm960_vm11 = vcmask (!%p216_p9), 560616   ;;  %vm1077_vm12 = vcmask (!%p216_p9), 642616   ;;  %vm1194_vm13 = vcmask (!%p216_p9), 724616  }
  0x12   : > { %s2241_s10 = smov (!%p216_p9), 61   ;;  %s2242_s11 = smov (!%p216_p9), 71   ;;  %vm1197_vm14 = vcmask (!%p216_p9), 650240   ;;  %vm1263_vm15 = vcmask (!%p216_p9), 1043456   ;;  %vm1348_vm5 = vcmask (!%p216_p9), 400712  }
  0x13   : > { %s2243_s12 = smov (!%p216_p9), 81   ;;  %s2246_s15 = smov (!%p216_p9), 117  }
  0x14   : > { %s2247_s16 = smov (!%p216_p9), 118  }
  0x15   : > { %s246_s13 = scalar_select %p245_p10, %s2318_s25, 1 }
  0x17   : > { %s1922_s14 = sshll.u32 %s246_s13, 5  ;;  %s2244_s13 = smov 126  }
  0x18   : > { %s2365_s17 = scalar_lea.vmem %s2928_s0, %s1922_s14  ;;  %s2245_s14 = smov 127  }
  0x19   : > { %v2371_v5 = vld [vmem:[%s2365_s17 + $0x8] sm:$0x1]  ;;  %v2374_v6 = vld [vmem:[%s2365_s17] sm:$0x1]  ;;  %v2381_v7 = vld [vmem:[%s2365_s17 + $0x10] sm:$0x1] }
  0x1a   : > { %266 = vrot.lane.b32.xlu0 %v2371_v5, %s2234_s18  ;;  %264 = vrot.lane.b32.xlu1 %v2374_v6, %s2234_s18  ;;  %v2384_v8 = vld [vmem:[%s2365_s17 + $0x18] sm:$0x1]  ;;  %v2391_v9 = vld [vmem:[%s2365_s17 + $0x9] sm:$0x1] }
  0x1b   : > { %v2394_v10 = vld [vmem:[%s2365_s17 + $0x11] sm:$0x1]  ;;  %v2401_v11 = vld [vmem:[%s2365_s17 + $0x1] sm:$0x1]  ;;  %v2404_v12 = vld [vmem:[%s2365_s17 + $0x19] sm:$0x1] }
  0x1c   : > { %v2411_v13 = vld [vmem:[%s2365_s17 + $0xa] sm:$0x1]  ;;  %v2414_v14 = vld [vmem:[%s2365_s17 + $0x12] sm:$0x1]  ;;  %v2421_v15 = vld [vmem:[%s2365_s17 + $0xb] sm:$0x1] }
  0x1d   : > { %v2424_v16 = vld [vmem:[%s2365_s17 + $0x2] sm:$0x1]  ;;  %v2431_v17 = vld [vmem:[%s2365_s17 + $0x1a] sm:$0x1]  ;;  %v2434_v18 = vld [vmem:[%s2365_s17 + $0x13] sm:$0x1] }
  0x1e   : > { %268 = vrot.lane.b32.xlu0 %v2381_v7, %s2234_s18  ;;  %270 = vrot.lane.b32.xlu1 %v2384_v8, %s2234_s18  ;;  %v2441_v19 = vld [vmem:[%s2365_s17 + $0x3] sm:$0x1]  ;;  %v2444_v20 = vld [vmem:[%s2365_s17 + $0x1b] sm:$0x1] }
  0x1f   : > { %v2451_v21 = vld [vmem:[%s2365_s17 + $0xc] sm:$0x1]  ;;  %v2454_v22 = vld [vmem:[%s2365_s17 + $0x14] sm:$0x1]  ;;  %v2461_v23 = vld [vmem:[%s2365_s17 + $0xd] sm:$0x1] }
  0x20   : > { %v2464_v24 = vld [vmem:[%s2365_s17 + $0x4] sm:$0x1]  ;;  %v2471_v25 = vld [vmem:[%s2365_s17 + $0x1c] sm:$0x1]  ;;  %v2474_v26 = vld [vmem:[%s2365_s17 + $0x15] sm:$0x1] }
  0x21   : > { %v2481_v27 = vld [vmem:[%s2365_s17 + $0x5] sm:$0x1]  ;;  %v2484_v28 = vld [vmem:[%s2365_s17 + $0x1d] sm:$0x1]  ;;  %v2491_v29 = vld [vmem:[%s2365_s17 + $0xe] sm:$0x1] }
  0x22   : > { %387 = vrot.lane.b32.xlu0 %v2391_v9, %s2234_s18  ;;  %389 = vrot.lane.b32.xlu1 %v2394_v10, %s2234_s18  ;;  %v2494_v30 = vld [vmem:[%s2365_s17 + $0x16] sm:$0x1]  ;;  %v2501_v31 = vld [vmem:[%s2365_s17 + $0xf] sm:$0x1] }
  0x23   : > { %v2504_v32 = vld [vmem:[%s2365_s17 + $0x6] sm:$0x1]  ;;  %v2511_v33 = vld [vmem:[%s2365_s17 + $0x1e] sm:$0x1]  ;;  %v2514_v34 = vld [vmem:[%s2365_s17 + $0x17] sm:$0x1] }
  0x24   : > { %v2521_v35 = vld [vmem:[%s2365_s17 + $0x7] sm:$0x1]  ;;  %v2524_v36 = vld [vmem:[%s2365_s17 + $0x1f] sm:$0x1]  ;;  %s2248_s17 = smov 108  }
  0x26   : > { %385 = vrot.lane.b32.xlu0 %v2401_v11, %s2234_s18  ;;  %391 = vrot.lane.b32.xlu1 %v2404_v12, %s2234_s18 }
  0x2a   : > { %504 = vrot.lane.b32.xlu0 %v2411_v13, %s2234_s18  ;;  %506 = vrot.lane.b32.xlu1 %v2414_v14, %s2234_s18 }
  0x2e   : > { %621 = vrot.lane.b32.xlu0 %v2421_v15, %s2234_s18  ;;  %502 = vrot.lane.b32.xlu1 %v2424_v16, %s2234_s18 }
  0x32   : > { %508 = vrot.lane.b32.xlu0 %v2431_v17, %s2234_s18  ;;  %623 = vrot.lane.b32.xlu1 %v2434_v18, %s2234_s18 }
  0x36   : > { %619 = vrot.lane.b32.xlu0 %v2441_v19, %s2234_s18  ;;  %625 = vrot.lane.b32.xlu1 %v2444_v20, %s2234_s18 }
  0x3a   : > { %738 = vrot.lane.b32.xlu0 %v2451_v21, %s2234_s18  ;;  %740 = vrot.lane.b32.xlu1 %v2454_v22, %s2234_s18 }
  0x3e   : > { %855 = vrot.lane.b32.xlu0 %v2461_v23, %s2234_s18  ;;  %736 = vrot.lane.b32.xlu1 %v2464_v24, %s2234_s18 }
  0x42   : > { %742 = vrot.lane.b32.xlu0 %v2471_v25, %s2234_s18  ;;  %857 = vrot.lane.b32.xlu1 %v2474_v26, %s2234_s18 }
  0x46   : > { %853 = vrot.lane.b32.xlu0 %v2481_v27, %s2234_s18  ;;  %859 = vrot.lane.b32.xlu1 %v2484_v28, %s2234_s18 }
  0x4a   : > { %972 = vrot.lane.b32.xlu0 %v2491_v29, %s2234_s18  ;;  %974 = vrot.lane.b32.xlu1 %v2494_v30, %s2234_s18 }
  0x4e   : > { %1089 = vrot.lane.b32.xlu0 %v2501_v31, %s2234_s18  ;;  %970 = vrot.lane.b32.xlu1 %v2504_v32, %s2234_s18 }
  0x52   : > { %976 = vrot.lane.b32.xlu0 %v2511_v33, %s2234_s18  ;;  %1091 = vrot.lane.b32.xlu1 %v2514_v34, %s2234_s18 }
  0x56   : > { %1087 = vrot.lane.b32.xlu0 %v2521_v35, %s2234_s18  ;;  %1093 = vrot.lane.b32.xlu1 %v2524_v36, %s2234_s18  ;;  %s2249_s18 = smov 116  }
  0x8c   : > { %v267_v37 = vpop.permute.xlu0 %266  ;;  %v265_v38 = vpop.permute.xlu1 %264 }
  0x8d   : > { %v277_v39 = vmax.f32 %v2371_v5, %v267_v37  ;;  %v276_v45 = vmax.f32 %v2374_v6, %v265_v38 }
  0x8f   : > { %v284_v40 = vrot.slane %v277_v39, 7 }
  0x90   : > { %v269_v41 = vpop.permute.xlu0 %268  ;;  %v271_v42 = vpop.permute.xlu1 %270 }
  0x91   : > { %v278_v43 = vmax.f32 %v2381_v7, %v269_v41  ;;  %v279_v44 = vmax.f32 %v2384_v8, %v271_v42  ;;  %v286_v48 = vsel %vm285_vm1, %v284_v40, %v276_v45 }
  0x93   : > { %v287_v46 = vrot.slane %v278_v43, 6  ;;  %v290_v47 = vrot.slane %v279_v44, 5 }
  0x94   : > { %v388_v49 = vpop.permute.xlu0 %387  ;;  %v390_v50 = vpop.permute.xlu1 %389 }
  0x95   : > { %v398_v51 = vmax.f32 %v2391_v9, %v388_v49  ;;  %v289_v52 = vsel %vm288_vm2, %v287_v46, %v286_v48  ;;  %v399_v53 = vmax.f32 %v2394_v10, %v390_v50 }
  0x96   : > { %v292_v54 = vsel %vm291_vm3, %v290_v47, %v289_v52 }
  0x97   : > { %1969 = vmatmul.mubr.msk.f32.vlgmr.msra.gmra.mrb[0].mxu0 %vm293_vm4, %v292_v54  ;;  %v405_v57 = vrot.slane %v398_v51, 7  ;;  %v407_v60 = vrot.slane %v399_v53, 6 }
  0x98   : > { %v386_v55 = vpop.permute.xlu0 %385  ;;  %v392_v56 = vpop.permute.xlu1 %391  ;;  %2059 = vmatpush3.bf16.msra.mxu0 %v2353_v3  ;;  %1975 = vmatprep.mubr.msk.f32.mxu0 %vm2232_vm0, %v2233_v4 }
  0x99   : > { %v397_v58 = vmax.f32 %v2401_v11, %v386_v55  ;;  %v400_v59 = vmax.f32 %v2404_v12, %v392_v56  ;;  %2060 = vmatprep.subr.bf16.mxu0 %v2231_v2 }
  0x9b   : > { %v406_v61 = vsel %vm285_vm1, %v405_v57, %v397_v58  ;;  %v409_v62 = vrot.slane %v400_v59, 5 }
  0x9c   : > { %v505_v63 = vpop.permute.xlu0 %504  ;;  %v507_v0 = vpop.permute.xlu1 %506  ;;  %v408_v1 = vsel %vm288_vm2, %v407_v60, %v406_v61 }
  0x9d   : > { %v410_v5 = vsel %vm291_vm3, %v409_v62, %v408_v1  ;;  %v515_v6 = vmax.f32 %v2411_v13, %v505_v63  ;;  %v516_v10 = vmax.f32 %v2414_v14, %v507_v0 }
  0x9e   : > { %1976 = vmatmul.mubr.msk.f32.vlgmr.msra.gmra.mrb[2].mxu0 %vm293_vm4, %v410_v5 }
  0x9f   : > { %2062 = vmatpush3.bf16.msra.mxu0 %v2353_v3  ;;  %1982 = vmatprep.mubr.msk.f32.mxu0 %vm2232_vm0, %v2233_v4  ;;  %v522_v11 = vrot.slane %v515_v6, 7  ;;  %v524_v40 = vrot.slane %v516_v10, 6 }
  0xa0   : > { %v622_v7 = vpop.permute.xlu0 %621  ;;  %v503_v8 = vpop.permute.xlu1 %502  ;;  %2066 = vmatprep.subr.bf16.mxu0 %v2231_v2 }
  0xa1   : > { %v514_v9 = vmax.f32 %v2424_v16, %v503_v8  ;;  %v632_v38 = vmax.f32 %v2421_v15, %v622_v7 }
  0xa3   : > { %v523_v13 = vsel %vm285_vm1, %v522_v11, %v514_v9  ;;  %v639_v16 = vrot.slane %v632_v38, 7 }
  0xa4   : > { %v509_v12 = vpop.permute.xlu0 %508  ;;  %v624_v37 = vpop.permute.xlu1 %623  ;;  %v525_v45 = vsel %vm288_vm2, %v524_v40, %v523_v13 }
  0xa5   : > { %v517_v39 = vmax.f32 %v2431_v17, %v509_v12  ;;  %v633_v41 = vmax.f32 %v2434_v18, %v624_v37 }
  0xa7   : > { %v526_v42 = vrot.slane %v517_v39, 5  ;;  %v641_v15 = vrot.slane %v633_v41, 6 }
  0xa8   : > { %v620_v43 = vpop.permute.xlu0 %619  ;;  %v626_v44 = vpop.permute.xlu1 %625 }
  0xa9   : > { %v631_v14 = vmax.f32 %v2441_v19, %v620_v43  ;;  %v634_v46 = vmax.f32 %v2444_v20, %v626_v44  ;;  %v527_v47 = vsel %vm291_vm3, %v526_v42, %v525_v45 }
  0xaa   : > { %1983 = vmatmul.mubr.msk.f32.vlgmr.msra.gmra.mrb[4].mxu0 %vm293_vm4, %v527_v47 }
  0xab   : > { %v640_v17 = vsel %vm285_vm1, %v639_v16, %v631_v14  ;;  %v643_v48 = vrot.slane %v634_v46, 5  ;;  %2068 = vmatpush3.bf16.msra.mxu0 %v2353_v3  ;;  %1996 = vmatprep.mubr.msk.f32.mxu0 %vm2232_vm0, %v2233_v4 }
  0xac   : > { %v739_v18 = vpop.permute.xlu0 %738  ;;  %v741_v49 = vpop.permute.xlu1 %740  ;;  %v642_v50 = vsel %vm288_vm2, %v641_v15, %v640_v17  ;;  %2072 = vmatprep.subr.bf16.mxu0 %v2231_v2 }
  0xad   : > { %v644_v19 = vsel %vm291_vm3, %v643_v48, %v642_v50  ;;  %v749_v20 = vmax.f32 %v2451_v21, %v739_v18  ;;  %v750_v54 = vmax.f32 %v2454_v22, %v741_v49 }
  0xae   : > { %1990 = vmatmul.mubr.msk.f32.vlgmr.msra.gmra.mrb[0].mxu1 %vm293_vm4, %v644_v19 }
  0xaf   : > { %2071 = vmatpush3.bf16.msra.mxu1 %v2353_v3  ;;  %2003 = vmatprep.mubr.msk.f32.mxu1 %vm2232_vm0, %v2233_v4  ;;  %v756_v55 = vrot.slane %v749_v20, 7  ;;  %v758_v60 = vrot.slane %v750_v54, 6 }
  0xb0   : > { %v856_v51 = vpop.permute.xlu0 %855  ;;  %v737_v52 = vpop.permute.xlu1 %736  ;;  %2075 = vmatprep.subr.bf16.mxu1 %v2231_v2 }
  0xb1   : > { %v748_v53 = vmax.f32 %v2464_v24, %v737_v52  ;;  %v866_v58 = vmax.f32 %v2461_v23, %v856_v51 }
  0xb3   : > { %v757_v21 = vsel %vm285_vm1, %v756_v55, %v748_v53  ;;  %v873_v24 = vrot.slane %v866_v58, 7 }
  0xb4   : > { %v743_v56 = vpop.permute.xlu0 %742  ;;  %v858_v57 = vpop.permute.xlu1 %857  ;;  %v759_v1 = vsel %vm288_vm2, %v758_v60, %v757_v21 }
  0xb5   : > { %v751_v59 = vmax.f32 %v2471_v25, %v743_v56  ;;  %v867_v61 = vmax.f32 %v2474_v26, %v858_v57 }
  0xb7   : > { %v760_v62 = vrot.slane %v751_v59, 5  ;;  %v875_v23 = vrot.slane %v867_v61, 6 }
  0xb8   : > { %v854_v63 = vpop.permute.xlu0 %853  ;;  %v860_v0 = vpop.permute.xlu1 %859 }
  0xb9   : > { %v865_v22 = vmax.f32 %v2481_v27, %v854_v63  ;;  %v868_v5 = vmax.f32 %v2484_v28, %v860_v0  ;;  %v761_v6 = vsel %vm291_vm3, %v760_v62, %v759_v1 }
  0xba   : > { %1997 = vmatmul.mubr.msk.f32.vlgmr.msra.gmra.mrb[6].mxu0 %vm293_vm4, %v761_v6 }
  0xbb   : > { %v874_v25 = vsel %vm285_vm1, %v873_v24, %v865_v22  ;;  %v877_v7 = vrot.slane %v868_v5, 5  ;;  %2074 = vmatpush3.bf16.msra.mxu0 %v2353_v3  ;;  %2010 = vmatprep.mubr.msk.f32.mxu0 %vm2232_vm0, %v2233_v4 }
  0xbc   : > { %v973_v26 = vpop.permute.xlu0 %972  ;;  %v975_v8 = vpop.permute.xlu1 %974  ;;  %v876_v9 = vsel %vm288_vm2, %v875_v23, %v874_v25  ;;  %2078 = vmatprep.subr.bf16.mxu0 %v2231_v2 }
  0xbd   : > { %v878_v27 = vsel %vm291_vm3, %v877_v7, %v876_v9  ;;  %v983_v28 = vmax.f32 %v2491_v29, %v973_v26  ;;  %v984_v37 = vmax.f32 %v2494_v30, %v975_v8 }
  0xbe   : > { %2004 = vmatmul.mubr.msk.f32.vlgmr.msra.gmra.mrb[2].mxu1 %vm293_vm4, %v878_v27 }
  0xbf   : > { %2077 = vmatpush3.bf16.msra.mxu1 %v2353_v3  ;;  %2017 = vmatprep.mubr.msk.f32.mxu1 %vm2232_vm0, %v2233_v4  ;;  %v990_v38 = vrot.slane %v983_v28, 7  ;;  %v992_v41 = vrot.slane %v984_v37, 6 }
  0xc0   : > { %v1090_v10 = vpop.permute.xlu0 %1089  ;;  %v971_v11 = vpop.permute.xlu1 %970  ;;  %2084 = vmatprep.subr.bf16.mxu1 %v2231_v2 }
  0xc1   : > { %v982_v12 = vmax.f32 %v2504_v32, %v971_v11  ;;  %v1100_v40 = vmax.f32 %v2501_v31, %v1090_v10 }
  0xc3   : > { %v991_v29 = vsel %vm285_vm1, %v990_v38, %v982_v12  ;;  %v1107_v32 = vrot.slane %v1100_v40, 7 }
  0xc4   : > { %v977_v13 = vpop.permute.xlu0 %976  ;;  %v1092_v39 = vpop.permute.xlu1 %1091  ;;  %v993_v44 = vsel %vm288_vm2, %v992_v41, %v991_v29 }
  0xc5   : > { %v985_v3 = vmax.f32 %v2511_v33, %v977_v13  ;;  %v1101_v42 = vmax.f32 %v2514_v34, %v1092_v39 }
  0xc7   : > { %v994_v43 = vrot.slane %v985_v3, 5  ;;  %v1109_v31 = vrot.slane %v1101_v42, 6 }
  0xc8   : > { %v1088_v45 = vpop.permute.xlu0 %1087  ;;  %v1094_v16 = vpop.permute.xlu1 %1093 }
  0xc9   : > { %v995_v30 = vsel %vm291_vm3, %v994_v43, %v993_v44  ;;  %v1099_v14 = vmax.f32 %v2521_v35, %v1088_v45  ;;  %v1102_v46 = vmax.f32 %v2524_v36, %v1094_v16  ;;  %v1253_v43 = vld [vmem:[%s2931_s3] sm:$0xff]  ;;  %v2252_v44 = vmov 0  }
  0xca   : > { %2011 = vmatmul.mubr.msk.f32.vlgmr.msra.gmra.mrb[8].mxu0 %vm293_vm4, %v995_v30  ;;  %2165 = vset.pattern.permute.xlu0 %v2252_v44 }
  0xcb   : > { %v1108_v33 = vsel %vm285_vm1, %v1107_v32, %v1099_v14  ;;  %v1111_v47 = vrot.slane %v1102_v46, 5  ;;  %2030 = vmatprep.mubr.msk.f32.mxu0 %vm2232_vm0, %v2233_v4  ;;  %2166 = vset.pattern.permute.xlu1 %v2252_v44  ;;  %vm252_vm1 = vcmask 900096  }
  0xcc   : > { %v1110_v34 = vsel %vm288_vm2, %v1109_v31, %v1108_v33  ;;  %253 = vst.msk [vmem:[#allocation3] sm:$0xff] %vm252_vm1, %v2233_v4  ;;  %vm1342_vm2 = vcmask 154712  }
  0xcd   : > { %v1112_v15 = vsel %vm291_vm3, %v1111_v47, %v1110_v34  ;;  %vm1344_vm3 = vcmask 236712  }
  0xce   : > { %2018 = vmatmul.mubr.msk.f32.vlgmr.msra.gmra.mrb[4].mxu1 %vm293_vm4, %v1112_v15  ;;  %vm1346_vm4 = vcmask 318712  }
  0xcf   : > { %2051 = vmatprep.mubr.msk.f32.mxu1 %vm2232_vm0, %v2233_v4  ;;  %vm1259_vm0 = vcmask 293888  }
 0x16a   : > { %v362_v35 = vpop.f32.mrb[0].mxu0 }
 0x16b   : > { %367 = vrot.lane.b32.xlu0 %v362_v35, %s2235_s19  ;;  %v1970_v36 = vpop.f32.mrb[1].mxu0 }
 0x171   : > { %v479_v17 = vpop.f32.mrb[2].mxu0 }
 0x172   : > { %v1977_v48 = vpop.f32.mrb[3].mxu0 }
 0x173   : > { %v1247_v48 = vld [vmem:[%s2930_s2] sm:$0xff] }
 0x17d   : > { %v596_v18 = vpop.f32.mrb[4].mxu0 }
 0x17e   : > { %601 = vrot.lane.b32.xlu0 %v596_v18, %s2235_s19  ;;  %v1984_v49 = vpop.f32.mrb[5].mxu0 }
 0x181   : > { %v713_v50 = vpop.f32.mrb[0].mxu1 }
 0x182   : > { %718 = vrot.lane.b32.xlu1 %v713_v50, %s2235_s19  ;;  %v1991_v19 = vpop.f32.mrb[1].mxu1 }
 0x186   : > { %484 = vrot.lane.b32.xlu1 %v479_v17, %s2235_s19 }
 0x18d   : > { %v830_v20 = vpop.f32.mrb[6].mxu0 }
 0x18e   : > { %835 = vrot.lane.b32.xlu0 %v830_v20, %s2235_s19  ;;  %v1998_v51 = vpop.f32.mrb[7].mxu0 }
 0x191   : > { %v947_v52 = vpop.f32.mrb[2].mxu1 }
 0x192   : > { %952 = vrot.lane.b32.xlu1 %v947_v52, %s2235_s19  ;;  %v2005_v53 = vpop.f32.mrb[3].mxu1 }
 0x19d   : > { %v1064_v54 = vpop.f32.mrb[8].mxu0 }
 0x19e   : > { %1069 = vrot.lane.b32.xlu0 %v1064_v54, %s2235_s19  ;;  %v2012_v55 = vpop.f32.mrb[9].mxu0 }
 0x1a1   : > { %v1181_v56 = vpop.f32.mrb[4].mxu1 }
 0x1a2   : > { %1186 = vrot.lane.b32.xlu1 %v1181_v56, %s2235_s19  ;;  %v2019_v57 = vpop.f32.mrb[5].mxu1  ;;  %s2250_s19 = smov 106  }
 0x1dd   : > { %v368_v58 = vpop.permute.xlu0 %367 }
 0x1de   : > { %v370_v21 = vmax.f32 %v362_v35, %v368_v58 }
 0x1e0   : > { %372 = vrot.lane.b32.xlu0 %v370_v21, %s2236_s20 }
 0x1f0   : > { %v602_v59 = vpop.permute.xlu0 %601 }
 0x1f1   : > { %v604_v60 = vmax.f32 %v596_v18, %v602_v59 }
 0x1f3   : > { %606 = vrot.lane.b32.xlu0 %v604_v60, %s2237_s26  ;;  %s2251_s26 = smov 107  }
 0x1f4   : > { %v719_v61 = vpop.permute.xlu1 %718 }
 0x1f5   : > { %v721_v62 = vmax.f32 %v713_v50, %v719_v61 }
 0x1f7   : > { %723 = vrot.lane.b32.xlu1 %v721_v62, %s2238_s28  ;;  %s2256_s28 = smov 78  }
 0x1f8   : > { %v485_v63 = vpop.permute.xlu1 %484 }
 0x1f9   : > { %v487_v0 = vmax.f32 %v479_v17, %v485_v63 }
 0x1fb   : > { %489 = vrot.lane.b32.xlu1 %v487_v0, %s2239_s29  ;;  %s2257_s29 = smov 68  }
 0x200   : > { %v836_v1 = vpop.permute.xlu0 %835 }
 0x201   : > { %v838_v24 = vmax.f32 %v830_v20, %v836_v1 }
 0x203   : > { %840 = vrot.lane.b32.xlu0 %v838_v24, %s2240_s9  ;;  %s2258_s9 = smov 58  }
 0x204   : > { %v953_v22 = vpop.permute.xlu1 %952 }
 0x205   : > { %v955_v5 = vmax.f32 %v947_v52, %v953_v22 }
 0x207   : > { %957 = vrot.lane.b32.xlu1 %v955_v5, %s2241_s10 }
 0x210   : > { %v1070_v6 = vpop.permute.xlu0 %1069 }
 0x211   : > { %v1072_v23 = vmax.f32 %v1064_v54, %v1070_v6  ;;  %v1419_v54 = vld [vmem:[%s2933_s5] sm:$0xff] }
 0x213   : > { %1074 = vrot.lane.b32.xlu0 %v1072_v23, %s2242_s11 }
 0x214   : > { %v1187_v25 = vpop.permute.xlu1 %1186 }
 0x215   : > { %v1189_v7 = vmax.f32 %v1181_v56, %v1187_v25 }
 0x217   : > { %1191 = vrot.lane.b32.xlu1 %v1189_v7, %s2243_s12 }
 0x252   : > { %v373_v26 = vpop.permute.xlu0 %372 }
 0x253   : > { %376 = vst.msk [vmem:[#allocation2] sm:$0xf] %vm375_vm6, %v373_v26  ;;  %vm1350_vm6 = vcmask 482712  }
 0x265   : > { %v607_v27 = vpop.permute.xlu0 %606 }
 0x269   : > { %v724_v8 = vpop.permute.xlu1 %723 }
 0x26d   : > { %v490_v9 = vpop.permute.xlu1 %489 }
 0x26e   : > { %493 = vst.msk [vmem:[#allocation2] sm:$0xf] %vm492_vm7, %v490_v9  ;;  %vm1352_vm7 = vcmask 564712  }
 0x26f   : > { %610 = vst.msk [vmem:[#allocation2] sm:$0xf] %vm609_vm8, %v607_v27  ;;  %vm1354_vm8 = vcmask 646712   ;;  %v2253_v27 = vmov 1966171168  }
 0x270   : > { %727 = vst.msk [vmem:[#allocation2] sm:$0xf] %vm726_vm9, %v724_v8  ;;  %vm1356_vm9 = vcmask 728712   ;;  %v1409_v8 = vld [vmem:[%s2932_s4] sm:$0xff] }
 0x275   : > { %v841_v28 = vpop.permute.xlu0 %840 }
 0x276   : > { %844 = vst.msk [vmem:[#allocation2] sm:$0xf] %vm843_vm10, %v841_v28  ;;  %vm1359_vm10 = vcmask 654336   ;;  %v1503_v28 = vunpack.c.l.s4 %v2253_v27 }
 0x279   : > { %v958_v10 = vpop.permute.xlu1 %957 }
 0x27a   : > { %961 = vst.msk [vmem:[#allocation2] sm:$0xf] %vm960_vm11, %v958_v10  ;;  %vm1425_vm11 = vcmask 588800   ;;  %v1505_v10 = vlaneseq }
 0x285   : > { %v1075_v11 = vpop.permute.xlu0 %1074 }
 0x286   : > { %1078 = vst.msk [vmem:[#allocation2] sm:$0xf] %vm1077_vm12, %v1075_v11  ;;  %v1506_v11 = vshrl.u32 %v1505_v10, 7  ;;  %vm1558_vm12 = vcmask 57344  }
 0x289   : > { %v1192_v12 = vpop.permute.xlu1 %1191 }
 0x28a   : > { %1195 = vst.msk [vmem:[#allocation2] sm:$0xf] %vm1194_vm13, %v1192_v12 }
 0x291   : > { %v1196_v37 = vld [vmem:[#allocation2] sm:$0xf] }
 0x292   : > { %v1205_v38 = vld [vmem:[#allocation2] sm:$0xf]  ;;  %1198 = vst.msk [vmem:[#allocation4] sm:$0xf] %vm1197_vm14, %v1196_v37 }
 0x293   : > { %v1199_v13 = vld [vmem:[#allocation2] sm:$0xf]  ;;  %1207 = vrot.lane.b32.xlu1 %v1205_v38, %s2244_s13 }
 0x294   : > { %1201 = vrot.lane.b32.xlu0 %v1199_v13, %s2245_s14  ;;  %v1217_v39 = vld [vmem:[#allocation2] sm:$0xf] }
 0x295   : > { %v1211_v40 = vld [vmem:[#allocation2] sm:$0xf] }
 0x296   : > { %v1229_v29 = vld [vmem:[#allocation2] sm:$0xf] }
 0x297   : > { %1219 = vrot.lane.b32.xlu1 %v1217_v39, %s2246_s15  ;;  %v1223_v3 = vld [vmem:[#allocation2] sm:$0xf] }
 0x298   : > { %1213 = vrot.lane.b32.xlu0 %v1211_v40, %s2247_s16  ;;  %v1241_v41 = vld [vmem:[#allocation2] sm:$0xf] }
 0x299   : > { %v1235_v42 = vld [vmem:[#allocation2] sm:$0xf] }
 0x29b   : > { %1231 = vrot.lane.b32.xlu1 %v1229_v29, %s2248_s17 }
 0x29c   : > { %1225 = vrot.lane.b32.xlu0 %v1223_v3, %s2249_s18  ;;  %v1569_v3 = vsub.s32 0, %v1506_v11 }
 0x29f   : > { %1243 = vrot.lane.b32.xlu1 %v1241_v41, %s2250_s19 }
 0x2a0   : > { %1237 = vrot.lane.b32.xlu0 %v1235_v42, %s2251_s26 }
 0x2a4   : > { %1256 = vperm.xlu0 %2165, %v1253_v43  }
 0x305   : > { %v1208_v45 = vpop.permute.xlu1 %1207 }
 0x306   : > { %v1202_v16 = vpop.permute.xlu0 %1201  ;;  %1210 = vst.msk [vmem:[#allocation4 + $0x8] sm:$0xf] %vm1197_vm14, %v1208_v45 }
 0x307   : > { %1204 = vst.msk [vmem:[#allocation4 + $0x4] sm:$0xf] %vm1197_vm14, %v1202_v16 }
 0x309   : > { %v1220_v32 = vpop.permute.xlu1 %1219 }
 0x30a   : > { %v1214_v30 = vpop.permute.xlu0 %1213  ;;  %1222 = vst.msk [vmem:[#allocation4 + $0x10] sm:$0xf] %vm1197_vm14, %v1220_v32 }
 0x30b   : > { %1216 = vst.msk [vmem:[#allocation4 + $0xc] sm:$0xf] %vm1197_vm14, %v1214_v30 }
 0x30d   : > { %v1232_v14 = vpop.permute.xlu1 %1231 }
 0x30e   : > { %v1226_v46 = vpop.permute.xlu0 %1225  ;;  %1234 = vst.msk [vmem:[#allocation4 + $0x18] sm:$0xf] %vm1197_vm14, %v1232_v14  ;;  %v1248_v47 = vld [vmem:[#allocation4] sm:$0xff] }
 0x30f   : > { %1228 = vst.msk [vmem:[#allocation4 + $0x14] sm:$0xf] %vm1197_vm14, %v1226_v46 }
 0x311   : > { %v1244_v31 = vpop.permute.xlu1 %1243 }
 0x312   : > { %v1238_v33 = vpop.permute.xlu0 %1237  ;;  %v1249_v34 = vld [vmem:[#allocation4 + $0x8] sm:$0xff]  ;;  %1246 = vst.msk [vmem:[#allocation4 + $0x20] sm:$0xf] %vm1197_vm14, %v1244_v31 }
 0x313   : > { %1240 = vst.msk [vmem:[#allocation4 + $0x1c] sm:$0xf] %vm1197_vm14, %v1238_v33  ;;  %v2079_v15 = vpack.c.bf16 %v1249_v34, %v1248_v47 }
 0x315   : > { %2080 = vmatpush3.bf16.msra.mxu0 %v2079_v15 }
 0x316   : > { %2081 = vmatprep.subr.bf16.mxu0 %v2231_v2  ;;  %v1250_v35 = vld [vmem:[#allocation4 + $0x10] sm:$0xff] }
 0x319   : > { %v1252_v18 = vld [vmem:[#allocation4 + $0x20] sm:$0xf] }
 0x31a   : > { %v1251_v36 = vld [vmem:[#allocation4 + $0x18] sm:$0xff] }
 0x31b   : > { %v2082_v17 = vpack.c.bf16 %v1251_v36, %v1250_v35 }
 0x31d   : > { %2083 = vmatpush3.bf16.msra.mxu0 %v2082_v17 }
 0x31e   : > { %2028 = vmatprep.subr.mxu0 %v2233_v4 }
 0x321   : > { %2029 = vmatpush3.msk.msra.mxu0 %vm1263_vm15, %v1252_v18 }
 0x322   : > { %2031 = vmatmul.mubr.msk.f32.vlgmr.msra.gmra.mrb[10].mxu0 %vm1259_vm0, %v1247_v48 }
 0x323   : > { %v1257_v49 = vpop.permute.xlu0 %1256 }
 0x3f5   : > { %v1333_v50 = vpop.f32.mrb[10].mxu0 }
 0x3f6   : > { %v1334_v19 = vadd.f32 %v1333_v50, %v1257_v49  ;;  %v2032_v20 = vpop.f32.mrb[11].mxu0 }
 0x3f8   : > { %v1337_v51 = vmax.f32 %v1334_v19, 0.0 }
 0x3fa   : > { %1339 = vrot.lane.b32.xlu1 %v1337_v51, %s2236_s20 }
 0x46c   : > { %v1340_v52 = vpop.permute.xlu1 %1339 }
 0x46d   : > { %1343 = vst.msk [vmem:[#allocation3] sm:$0xff] %vm1342_vm2, %v1340_v52 }
 0x46e   : > { %1345 = vst.msk [vmem:[#allocation3] sm:$0xff] %vm1344_vm3, %v1340_v52 }
 0x46f   : > { %1347 = vst.msk [vmem:[#allocation3] sm:$0xff] %vm1346_vm4, %v1340_v52 }
 0x470   : > { %1349 = vst.msk [vmem:[#allocation3] sm:$0xff] %vm1348_vm5, %v1340_v52 }
 0x471   : > { %1351 = vst.msk [vmem:[#allocation3] sm:$0xff] %vm1350_vm6, %v1340_v52 }
 0x472   : > { %1353 = vst.msk [vmem:[#allocation3] sm:$0xff] %vm1352_vm7, %v1340_v52 }
 0x473   : > { %1355 = vst.msk [vmem:[#allocation3] sm:$0xff] %vm1354_vm8, %v1340_v52 }
 0x474   : > { %1357 = vst.msk [vmem:[#allocation3] sm:$0xff] %vm1356_vm9, %v1340_v52 }
 0x47b   : > { %v1367_v53 = vld [vmem:[#allocation3] sm:$0xff] }
 0x47c   : > { %1369 = vrot.lane.b32.xlu0 %v1367_v53, %s2244_s13  ;;  %1363 = vrot.lane.b32.xlu1 %v1367_v53, %s2245_s14  ;;  %1360 = vst.msk [vmem:[#allocation5] sm:$0xff] %vm1359_vm10, %v1367_v53  ;;  %s242_s14 = sand.u32 1, %s2221_s22   ;;  %s2259_s13 = smov [#allocation6]  }
 0x480   : > { %1381 = vrot.lane.b32.xlu0 %v1367_v53, %s2246_s15  ;;  %1375 = vrot.lane.b32.xlu1 %v1367_v53, %s2247_s16  ;;  %s1903_s15 = sshll.u32 %s242_s14, 6 }
 0x483   : > { %v1410_v60 = vld [vmem:[#allocation5] sm:$0xff] }
 0x484   : > { %1393 = vrot.lane.b32.xlu0 %v1367_v53, %s2248_s17  ;;  %1387 = vrot.lane.b32.xlu1 %v1367_v53, %s2249_s18  ;;  %s2681_s18 = scalar_lea.vmem [#allocation6], %s1903_s15  ;;  %s2171_s15 = sshll.u32 %s2259_s13, 4  ;;  %s2172_s15 = int_to_ptr.vmem [resolvable:$false] %s2171_s15 }
 0x488   : > { %1405 = vrot.lane.b32.xlu0 %v1367_v53, %s2250_s19  ;;  %1399 = vrot.lane.b32.xlu1 %v1367_v53, %s2251_s26  ;;  %s2254_s19 = smov 98   ;;  %s2255_s26 = smov 88  }
 0x48c   : > { %1422 = vperm.xlu1 %2166, %v1419_v54  }
 0x4ee   : > { %v1370_v55 = vpop.permute.xlu0 %1369  ;;  %v1364_v56 = vpop.permute.xlu1 %1363 }
 0x4ef   : > { %1372 = vst.msk [vmem:[#allocation5 + $0x10] sm:$0xff] %vm1359_vm10, %v1370_v55  ;;  %1366 = vst.msk [vmem:[#allocation5 + $0x8] sm:$0xff] %vm1359_vm10, %v1364_v56 }
 0x4f2   : > { %v1382_v57 = vpop.permute.xlu0 %1381  ;;  %v1376_v58 = vpop.permute.xlu1 %1375 }
 0x4f3   : > { %1384 = vst.msk [vmem:[#allocation5 + $0x20] sm:$0xff] %vm1359_vm10, %v1382_v57  ;;  %1378 = vst.msk [vmem:[#allocation5 + $0x18] sm:$0xff] %vm1359_vm10, %v1376_v58 }
 0x4f6   : > { %v1394_v21 = vpop.permute.xlu0 %1393  ;;  %v1388_v59 = vpop.permute.xlu1 %1387  ;;  %v1411_v61 = vld [vmem:[#allocation5 + $0x8] sm:$0xff]  ;;  %v1412_v1 = vld [vmem:[#allocation5 + $0x10] sm:$0xff] }
 0x4f7   : > { %1396 = vst.msk [vmem:[#allocation5 + $0x30] sm:$0xff] %vm1359_vm10, %v1394_v21  ;;  %1390 = vst.msk [vmem:[#allocation5 + $0x28] sm:$0xff] %vm1359_vm10, %v1388_v59  ;;  %v2085_v62 = vpack.c.bf16 %v1411_v61, %v1410_v60 }
 0x4f9   : > { %2086 = vmatpush3.bf16.msra.mxu1 %v2085_v62 }
 0x4fa   : > { %v1406_v63 = vpop.permute.xlu0 %1405  ;;  %v1400_v0 = vpop.permute.xlu1 %1399  ;;  %2087 = vmatprep.subr.bf16.mxu1 %v2231_v2  ;;  %v1413_v24 = vld [vmem:[#allocation5 + $0x18] sm:$0xff]  ;;  %v1414_v5 = vld [vmem:[#allocation5 + $0x20] sm:$0xff] }
 0x4fb   : > { %1408 = vst.msk [vmem:[#allocation5 + $0x40] sm:$0xff] %vm1359_vm10, %v1406_v63  ;;  %1402 = vst.msk [vmem:[#allocation5 + $0x38] sm:$0xff] %vm1359_vm10, %v1400_v0  ;;  %v2088_v22 = vpack.c.bf16 %v1413_v24, %v1412_v1 }
 0x4fd   : > { %2089 = vmatpush3.bf16.msra.mxu1 %v2088_v22 }
 0x4fe   : > { %2090 = vmatprep.subr.bf16.mxu1 %v2231_v2  ;;  %v1415_v6 = vld [vmem:[#allocation5 + $0x28] sm:$0xff]  ;;  %v1416_v25 = vld [vmem:[#allocation5 + $0x30] sm:$0xff] }
 0x4ff   : > { %v2091_v23 = vpack.c.bf16 %v1415_v6, %v1414_v5 }
 0x501   : > { %2092 = vmatpush3.bf16.msra.mxu1 %v2091_v23 }
 0x502   : > { %2093 = vmatprep.subr.bf16.mxu1 %v2231_v2  ;;  %v1417_v7 = vld [vmem:[#allocation5 + $0x38] sm:$0xff]  ;;  %v1418_v9 = vld [vmem:[#allocation5 + $0x40] sm:$0xff]  ;;  %v1504_v2 = vunpack.c.0.s8 %v1503_v28 }
 0x503   : > { %v2094_v26 = vpack.c.bf16 %v1417_v7, %v1416_v25 }
 0x504   : > { %v1507_v13 = vsub.s32 %v1504_v2, %v1506_v11 }
 0x505   : > { %2095 = vmatpush3.bf16.msra.mxu1 %v2094_v26 }
 0x506   : > { %2049 = vmatprep.subr.mxu1 %v2233_v4 }
 0x509   : > { %2050 = vmatpush3.msra.mxu1 %v1418_v9 }
 0x50a   : > { %2052 = vmatmul.mubr.msk.f32.vlgmr.msra.gmra.mrb[6].mxu1 %vm1425_vm11, %v1409_v8 }
 0x50b   : > { %v1423_v12 = vpop.permute.xlu1 %1422 }
 0x5dd   : > { %v1495_v37 = vpop.f32.mrb[6].mxu1 }
 0x5de   : > { %v1496_v38 = vadd.f32 %v1495_v37, %v1423_v12  ;;  %v2053_v4 = vpop.f32.mrb[7].mxu1 }
 0x5e0   : > { %v1499_v39 = vmax.f32 %v1496_v38, 0.0 }
 0x5e2   : > { %v1501_v40 = vcombine.high %v1499_v39, %v1499_v39  ;;  %v1508_v29 = vrot.slane %v1499_v39, %v1507_v13 }
 0x5e4   : > { %v1515_v41 = vrot.slane %v1501_v40, %v1507_v13  ;;  %v1516_v42 = vcombine.high %v1508_v29, %v1508_v29  ;;  %v1524_v43 = vrot.slane %v1508_v29, %v1507_v13 }
 0x5e6   : > { %v1517_v44 = vcombine.high %v1515_v41, %v1515_v41  ;;  %v1531_v45 = vrot.slane %v1515_v41, %v1507_v13  ;;  %v1538_v16 = vrot.slane %v1516_v42, %v1507_v13  ;;  %v1546_v32 = vcombine.high %v1524_v43, %v1524_v43  ;;  %1559 = vst.msk [vmem:[%s2681_s18] sm:$0x1] %vm1558_vm12, %v1524_v43 }
 0x5e7   : > { %v1570_v30 = vrot.slane %v1524_v43, %v1569_v3 }
 0x5e8   : > { %v1545_v14 = vrot.slane %v1517_v44, %v1507_v13  ;;  %v1547_v46 = vcombine.high %v1531_v45, %v1531_v45  ;;  %v1548_v31 = vcombine.high %v1538_v16, %v1538_v16  ;;  %1560 = vst.msk [vmem:[%s2681_s18 + $0x8] sm:$0x1] %vm1558_vm12, %v1538_v16  ;;  %1561 = vst.msk [vmem:[%s2681_s18 + $0x10] sm:$0x1] %vm1558_vm12, %v1546_v32 }
 0x5e9   : > { %1563 = vst.msk [vmem:[%s2681_s18 + $0x20] sm:$0x1] %vm1558_vm12, %v1531_v45  ;;  %v1574_v33 = vrot.slane %v1538_v16, %v1569_v3  ;;  %1599 = vrot.lane.b32.xlu0 %v1570_v30, %s2247_s16  ;;  %v1578_v35 = vrot.slane %v1546_v32, %v1569_v3  ;;  %v1586_v17 = vrot.slane %v1531_v45, %v1569_v3 }
 0x5ea   : > { %v1549_v47 = vcombine.high %v1545_v14, %v1545_v14  ;;  %1562 = vst.msk [vmem:[%s2681_s18 + $0x18] sm:$0x1] %vm1558_vm12, %v1548_v31  ;;  %1564 = vst.msk [vmem:[%s2681_s18 + $0x28] sm:$0x1] %vm1558_vm12, %v1545_v14  ;;  %v2698_v34 = vrot.slane %v1547_v46, %v1569_v3  ;;  %v1582_v36 = vrot.slane %v1548_v31, %v1569_v3 }
 0x5eb   : > { %1565 = vst.msk [vmem:[%s2681_s18 + $0x30] sm:$0x1] %vm1558_vm12, %v1547_v46  ;;  %1601 = vrot.lane.b32.xlu1 %v1574_v33, %s2247_s16  ;;  %v1590_v48 = vrot.slane %v1545_v14, %v1569_v3 }
 0x5ec   : > { %1566 = vst.msk [vmem:[%s2681_s18 + $0x38] sm:$0x1] %vm1558_vm12, %v1549_v47  ;;  %v1598_v15 = vrot.slane %v1549_v47, %v1569_v3 }
 0x5ed   : > { %1631 = vrot.lane.b32.xlu0 %v1570_v30, %s2248_s17 }
 0x5ef   : > { %1633 = vrot.lane.b32.xlu1 %v1574_v33, %s2248_s17 }
 0x5f1   : > { %1663 = vrot.lane.b32.xlu0 %v1570_v30, %s2254_s19 }
 0x5f3   : > { %1665 = vrot.lane.b32.xlu1 %v1574_v33, %s2254_s19 }
 0x5f5   : > { %1695 = vrot.lane.b32.xlu0 %v1570_v30, %s2255_s26 }
 0x5f7   : > { %1697 = vrot.lane.b32.xlu1 %v1574_v33, %s2255_s26 }
 0x5f9   : > { %1727 = vrot.lane.b32.xlu0 %v1570_v30, %s2256_s28 }
 0x5fb   : > { %1729 = vrot.lane.b32.xlu1 %v1574_v33, %s2256_s28 }
 0x5fd   : > { %1759 = vrot.lane.b32.xlu0 %v1570_v30, %s2257_s29 }
 0x5ff   : > { %1761 = vrot.lane.b32.xlu1 %v1574_v33, %s2257_s29 }
 0x601   : > { %1791 = vrot.lane.b32.xlu0 %v1570_v30, %s2258_s9 }
 0x603   : > { %1793 = vrot.lane.b32.xlu1 %v1574_v33, %s2258_s9 }
 0x605   : > { %1603 = vrot.lane.b32.xlu0 %v1578_v35, %s2247_s16 }
 0x607   : > { %1605 = vrot.lane.b32.xlu1 %v1582_v36, %s2247_s16 }
 0x609   : > { %1607 = vrot.lane.b32.xlu0 %v1586_v17, %s2247_s16 }
 0x60b   : > { %1609 = vrot.lane.b32.xlu1 %v1590_v48, %s2247_s16 }
 0x60d   : > { %1635 = vrot.lane.b32.xlu0 %v1578_v35, %s2248_s17 }
 0x60f   : > { %1637 = vrot.lane.b32.xlu1 %v1582_v36, %s2248_s17 }
 0x611   : > { %1639 = vrot.lane.b32.xlu0 %v1586_v17, %s2248_s17 }
 0x613   : > { %1641 = vrot.lane.b32.xlu1 %v1590_v48, %s2248_s17 }
 0x615   : > { %1667 = vrot.lane.b32.xlu0 %v1578_v35, %s2254_s19 }
 0x617   : > { %1669 = vrot.lane.b32.xlu1 %v1582_v36, %s2254_s19 }
 0x619   : > { %1671 = vrot.lane.b32.xlu0 %v1586_v17, %s2254_s19 }
 0x61b   : > { %1673 = vrot.lane.b32.xlu1 %v1590_v48, %s2254_s19 }
 0x61d   : > { %1699 = vrot.lane.b32.xlu0 %v1578_v35, %s2255_s26 }
 0x61f   : > { %1701 = vrot.lane.b32.xlu1 %v1582_v36, %s2255_s26 }
 0x621   : > { %1703 = vrot.lane.b32.xlu0 %v1586_v17, %s2255_s26 }
 0x623   : > { %1705 = vrot.lane.b32.xlu1 %v1590_v48, %s2255_s26 }
 0x625   : > { %1731 = vrot.lane.b32.xlu0 %v1578_v35, %s2256_s28 }
 0x627   : > { %1733 = vrot.lane.b32.xlu1 %v1582_v36, %s2256_s28 }
 0x629   : > { %1735 = vrot.lane.b32.xlu0 %v1586_v17, %s2256_s28 }
 0x62b   : > { %1737 = vrot.lane.b32.xlu1 %v1590_v48, %s2256_s28 }
 0x62d   : > { %1763 = vrot.lane.b32.xlu0 %v1578_v35, %s2257_s29 }
 0x62f   : > { %1765 = vrot.lane.b32.xlu1 %v1582_v36, %s2257_s29 }
 0x631   : > { %1767 = vrot.lane.b32.xlu0 %v1586_v17, %s2257_s29 }
 0x633   : > { %1769 = vrot.lane.b32.xlu1 %v1590_v48, %s2257_s29 }
 0x635   : > { %1795 = vrot.lane.b32.xlu0 %v1578_v35, %s2258_s9 }
 0x637   : > { %1797 = vrot.lane.b32.xlu1 %v1582_v36, %s2258_s9 }
 0x639   : > { %1799 = vrot.lane.b32.xlu0 %v1586_v17, %s2258_s9 }
 0x63b   : > { %1801 = vrot.lane.b32.xlu1 %v1590_v48, %s2258_s9 }
 0x63d   : > { %1611 = vrot.lane.b32.xlu0 %v2698_v34, %s2247_s16 }
 0x63f   : > { %1613 = vrot.lane.b32.xlu1 %v1598_v15, %s2247_s16  ;;  %s1923_s16 = sshll.u32 %s2318_s25, 10  ;;  %s2887_s25 = scalar_lea.sflag [#allocation7], %s242_s14 }
 0x640   : > { %s2877_s11 = scalar_lea.hbm %s2934_s6, %s1923_s16 }
 0x641   : > { %1643 = vrot.lane.b32.xlu0 %v2698_v34, %s2248_s17 }
 0x643   : > { %1645 = vrot.lane.b32.xlu1 %v1598_v15, %s2248_s17  ;;  %s1837_s17 = sshll.u32 %s2681_s18, 4  ;;  %s2879_s17 = int_to_ptr.vmem [resolvable:$true] %s1837_s17 }
 0x644   : > { %s2167_s12 = scalar_lea.vmem %s2879_s17, 1024  ;;  %p2174_p0 = scmp.lt.s32.totalorder %s2879_s17, %s2172_s15 }
 0x645   : > { %1675 = vrot.lane.b32.xlu0 %v2698_v34, %s2254_s19  ;;  %p2168_p11 = scmp.ne.s32.totalorder %s2879_s17, %s2167_s12 }
 0x647   : > { %1677 = vrot.lane.b32.xlu1 %v1598_v15, %s2254_s19  ;;  %p2169_p12 = pnand %p2168_p11, %p2335_p5  ;;  %s2173_s19 = scalar_lea.vmem %s2172_s15, 2048 }
 0x648   : > { %p2175_p1 = scmp.lt.s32.totalorder %s2173_s19, %s2167_s12 }
 0x649   : > { %1707 = vrot.lane.b32.xlu0 %v2698_v34, %s2255_s26  ;;  %p2170_p13 = pneg %p2169_p12 }
 0x64a   : > { %p2176_p2 = por %p2175_p1, %p2174_p0 }
 0x64b   : > { %1709 = vrot.lane.b32.xlu1 %v1598_v15, %s2255_s26 }
 0x64c   : > { %p2177_p3 = pnand %p2176_p2, %p2170_p13 }
 0x64d   : > { %1739 = vrot.lane.b32.xlu0 %v2698_v34, %s2256_s28 }
 0x64f   : > { %1741 = vrot.lane.b32.xlu1 %v1598_v15, %s2256_s28 }
 0x651   : > { %1771 = vrot.lane.b32.xlu0 %v2698_v34, %s2257_s29 }
 0x653   : > { %1773 = vrot.lane.b32.xlu1 %v1598_v15, %s2257_s29 }
 0x655   : > { %1803 = vrot.lane.b32.xlu0 %v2698_v34, %s2258_s9 }
 0x657   : > { %1805 = vrot.lane.b32.xlu1 %v1598_v15, %s2258_s9 }
 0x65b   : > { %v1600_v18 = vpop.permute.xlu0 %1599 }
 0x65c   : > { %1623 = vst.msk [vmem:[%s2681_s18 + $0x1] sm:$0x1] %vm1558_vm12, %v1600_v18 }
 0x65d   : > { %v1602_v49 = vpop.permute.xlu1 %1601 }
 0x65e   : > { %1624 = vst.msk [vmem:[%s2681_s18 + $0x9] sm:$0x1] %vm1558_vm12, %v1602_v49 }
 0x65f   : > { %v1632_v50 = vpop.permute.xlu0 %1631 }
 0x660   : > { %1655 = vst.msk [vmem:[%s2681_s18 + $0x2] sm:$0x1] %vm1558_vm12, %v1632_v50 }
 0x661   : > { %v1634_v19 = vpop.permute.xlu1 %1633 }
 0x662   : > { %1656 = vst.msk [vmem:[%s2681_s18 + $0xa] sm:$0x1] %vm1558_vm12, %v1634_v19 }
 0x663   : > { %v1664_v20 = vpop.permute.xlu0 %1663 }
 0x664   : > { %1687 = vst.msk [vmem:[%s2681_s18 + $0x3] sm:$0x1] %vm1558_vm12, %v1664_v20 }
 0x665   : > { %v1666_v51 = vpop.permute.xlu1 %1665 }
 0x666   : > { %1688 = vst.msk [vmem:[%s2681_s18 + $0xb] sm:$0x1] %vm1558_vm12, %v1666_v51 }
 0x667   : > { %v1696_v52 = vpop.permute.xlu0 %1695 }
 0x668   : > { %1719 = vst.msk [vmem:[%s2681_s18 + $0x4] sm:$0x1] %vm1558_vm12, %v1696_v52 }
 0x669   : > { %v1698_v53 = vpop.permute.xlu1 %1697 }
 0x66a   : > { %1720 = vst.msk [vmem:[%s2681_s18 + $0xc] sm:$0x1] %vm1558_vm12, %v1698_v53 }
 0x66b   : > { %v1728_v54 = vpop.permute.xlu0 %1727 }
 0x66c   : > { %1751 = vst.msk [vmem:[%s2681_s18 + $0x5] sm:$0x1] %vm1558_vm12, %v1728_v54 }
 0x66d   : > { %v1730_v55 = vpop.permute.xlu1 %1729 }
 0x66e   : > { %1752 = vst.msk [vmem:[%s2681_s18 + $0xd] sm:$0x1] %vm1558_vm12, %v1730_v55 }
 0x66f   : > { %v1760_v56 = vpop.permute.xlu0 %1759 }
 0x670   : > { %1783 = vst.msk [vmem:[%s2681_s18 + $0x6] sm:$0x1] %vm1558_vm12, %v1760_v56 }
 0x671   : > { %v1762_v57 = vpop.permute.xlu1 %1761 }
 0x672   : > { %1784 = vst.msk [vmem:[%s2681_s18 + $0xe] sm:$0x1] %vm1558_vm12, %v1762_v57 }
 0x673   : > { %v1792_v58 = vpop.permute.xlu0 %1791 }
 0x674   : > { %1815 = vst.msk [vmem:[%s2681_s18 + $0x7] sm:$0x1] %vm1558_vm12, %v1792_v58 }
 0x675   : > { %v1794_v21 = vpop.permute.xlu1 %1793 }
 0x676   : > { %1816 = vst.msk [vmem:[%s2681_s18 + $0xf] sm:$0x1] %vm1558_vm12, %v1794_v21 }
 0x677   : > { %v1604_v59 = vpop.permute.xlu0 %1603 }
 0x678   : > { %1625 = vst.msk [vmem:[%s2681_s18 + $0x11] sm:$0x1] %vm1558_vm12, %v1604_v59 }
 0x679   : > { %v1606_v60 = vpop.permute.xlu1 %1605 }
 0x67a   : > { %1626 = vst.msk [vmem:[%s2681_s18 + $0x19] sm:$0x1] %vm1558_vm12, %v1606_v60 }
 0x67b   : > { %v1608_v61 = vpop.permute.xlu0 %1607 }
 0x67c   : > { %1627 = vst.msk [vmem:[%s2681_s18 + $0x21] sm:$0x1] %vm1558_vm12, %v1608_v61 }
 0x67d   : > { %v1610_v62 = vpop.permute.xlu1 %1609 }
 0x67e   : > { %1628 = vst.msk [vmem:[%s2681_s18 + $0x29] sm:$0x1] %vm1558_vm12, %v1610_v62 }
 0x67f   : > { %v1636_v63 = vpop.permute.xlu0 %1635 }
 0x680   : > { %1657 = vst.msk [vmem:[%s2681_s18 + $0x12] sm:$0x1] %vm1558_vm12, %v1636_v63 }
 0x681   : > { %v1638_v0 = vpop.permute.xlu1 %1637 }
 0x682   : > { %1658 = vst.msk [vmem:[%s2681_s18 + $0x1a] sm:$0x1] %vm1558_vm12, %v1638_v0 }
 0x683   : > { %v1640_v1 = vpop.permute.xlu0 %1639 }
 0x684   : > { %1659 = vst.msk [vmem:[%s2681_s18 + $0x22] sm:$0x1] %vm1558_vm12, %v1640_v1 }
 0x685   : > { %v1642_v24 = vpop.permute.xlu1 %1641 }
 0x686   : > { %1660 = vst.msk [vmem:[%s2681_s18 + $0x2a] sm:$0x1] %vm1558_vm12, %v1642_v24 }
 0x687   : > { %v1668_v22 = vpop.permute.xlu0 %1667 }
 0x688   : > { %1689 = vst.msk [vmem:[%s2681_s18 + $0x13] sm:$0x1] %vm1558_vm12, %v1668_v22 }
 0x689   : > { %v1670_v5 = vpop.permute.xlu1 %1669 }
 0x68a   : > { %1690 = vst.msk [vmem:[%s2681_s18 + $0x1b] sm:$0x1] %vm1558_vm12, %v1670_v5 }
 0x68b   : > { %v1672_v6 = vpop.permute.xlu0 %1671 }
 0x68c   : > { %1691 = vst.msk [vmem:[%s2681_s18 + $0x23] sm:$0x1] %vm1558_vm12, %v1672_v6 }
 0x68d   : > { %v1674_v23 = vpop.permute.xlu1 %1673 }
 0x68e   : > { %1692 = vst.msk [vmem:[%s2681_s18 + $0x2b] sm:$0x1] %vm1558_vm12, %v1674_v23 }
 0x68f   : > { %v1700_v25 = vpop.permute.xlu0 %1699 }
 0x690   : > { %1721 = vst.msk [vmem:[%s2681_s18 + $0x14] sm:$0x1] %vm1558_vm12, %v1700_v25 }
 0x691   : > { %v1702_v7 = vpop.permute.xlu1 %1701 }
 0x692   : > { %1722 = vst.msk [vmem:[%s2681_s18 + $0x1c] sm:$0x1] %vm1558_vm12, %v1702_v7 }
 0x693   : > { %v1704_v26 = vpop.permute.xlu0 %1703 }
 0x694   : > { %1723 = vst.msk [vmem:[%s2681_s18 + $0x24] sm:$0x1] %vm1558_vm12, %v1704_v26 }
 0x695   : > { %v1706_v8 = vpop.permute.xlu1 %1705 }
 0x696   : > { %1724 = vst.msk [vmem:[%s2681_s18 + $0x2c] sm:$0x1] %vm1558_vm12, %v1706_v8 }
 0x697   : > { %v1732_v9 = vpop.permute.xlu0 %1731 }
 0x698   : > { %1753 = vst.msk [vmem:[%s2681_s18 + $0x15] sm:$0x1] %vm1558_vm12, %v1732_v9 }
 0x699   : > { %v1734_v27 = vpop.permute.xlu1 %1733 }
 0x69a   : > { %1754 = vst.msk [vmem:[%s2681_s18 + $0x1d] sm:$0x1] %vm1558_vm12, %v1734_v27 }
 0x69b   : > { %v1736_v28 = vpop.permute.xlu0 %1735 }
 0x69c   : > { %1755 = vst.msk [vmem:[%s2681_s18 + $0x25] sm:$0x1] %vm1558_vm12, %v1736_v28 }
 0x69d   : > { %v1738_v10 = vpop.permute.xlu1 %1737 }
 0x69e   : > { %1756 = vst.msk [vmem:[%s2681_s18 + $0x2d] sm:$0x1] %vm1558_vm12, %v1738_v10 }
 0x69f   : > { %v1764_v2 = vpop.permute.xlu0 %1763 }
 0x6a0   : > { %1785 = vst.msk [vmem:[%s2681_s18 + $0x16] sm:$0x1] %vm1558_vm12, %v1764_v2 }
 0x6a1   : > { %v1766_v11 = vpop.permute.xlu1 %1765 }
 0x6a2   : > { %1786 = vst.msk [vmem:[%s2681_s18 + $0x1e] sm:$0x1] %vm1558_vm12, %v1766_v11 }
 0x6a3   : > { %v1768_v12 = vpop.permute.xlu0 %1767 }
 0x6a4   : > { %1787 = vst.msk [vmem:[%s2681_s18 + $0x26] sm:$0x1] %vm1558_vm12, %v1768_v12 }
 0x6a5   : > { %v1770_v37 = vpop.permute.xlu1 %1769 }
 0x6a6   : > { %1788 = vst.msk [vmem:[%s2681_s18 + $0x2e] sm:$0x1] %vm1558_vm12, %v1770_v37 }
 0x6a7   : > { %v1796_v38 = vpop.permute.xlu0 %1795 }
 0x6a8   : > { %1817 = vst.msk [vmem:[%s2681_s18 + $0x17] sm:$0x1] %vm1558_vm12, %v1796_v38 }
 0x6a9   : > { %v1798_v13 = vpop.permute.xlu1 %1797 }
 0x6aa   : > { %1818 = vst.msk [vmem:[%s2681_s18 + $0x1f] sm:$0x1] %vm1558_vm12, %v1798_v13 }
 0x6ab   : > { %v1800_v4 = vpop.permute.xlu0 %1799 }
 0x6ac   : > { %1819 = vst.msk [vmem:[%s2681_s18 + $0x27] sm:$0x1] %vm1558_vm12, %v1800_v4 }
 0x6ad   : > { %v1802_v39 = vpop.permute.xlu1 %1801 }
 0x6ae   : > { %1820 = vst.msk [vmem:[%s2681_s18 + $0x2f] sm:$0x1] %vm1558_vm12, %v1802_v39 }
 0x6af   : > { %v1612_v40 = vpop.permute.xlu0 %1611 }
 0x6b0   : > { %1629 = vst.msk [vmem:[%s2681_s18 + $0x31] sm:$0x1] %vm1558_vm12, %v1612_v40 }
 0x6b1   : > { %v1614_v29 = vpop.permute.xlu1 %1613 }
 0x6b2   : > { %1630 = vst.msk [vmem:[%s2681_s18 + $0x39] sm:$0x1] %vm1558_vm12, %v1614_v29 }
 0x6b3   : > { %v1644_v3 = vpop.permute.xlu0 %1643 }
 0x6b4   : > { %1661 = vst.msk [vmem:[%s2681_s18 + $0x32] sm:$0x1] %vm1558_vm12, %v1644_v3 }
 0x6b5   : > { %v1646_v41 = vpop.permute.xlu1 %1645 }
 0x6b6   : > { %1662 = vst.msk [vmem:[%s2681_s18 + $0x3a] sm:$0x1] %vm1558_vm12, %v1646_v41 }
 0x6b7   : > { %v1676_v42 = vpop.permute.xlu0 %1675 }
 0x6b8   : > { %1693 = vst.msk [vmem:[%s2681_s18 + $0x33] sm:$0x1] %vm1558_vm12, %v1676_v42 }
 0x6b9   : > { %v1678_v43 = vpop.permute.xlu1 %1677 }
 0x6ba   : > { %1694 = vst.msk [vmem:[%s2681_s18 + $0x3b] sm:$0x1] %vm1558_vm12, %v1678_v43 }
 0x6bb   : > { %v1708_v44 = vpop.permute.xlu0 %1707 }
 0x6bc   : > { %1725 = vst.msk [vmem:[%s2681_s18 + $0x34] sm:$0x1] %vm1558_vm12, %v1708_v44 }
 0x6bd   : > { %v1710_v45 = vpop.permute.xlu1 %1709 }
 0x6be   : > { %1726 = vst.msk [vmem:[%s2681_s18 + $0x3c] sm:$0x1] %vm1558_vm12, %v1710_v45 }
 0x6bf   : > { %v1740_v16 = vpop.permute.xlu0 %1739 }
 0x6c0   : > { %1757 = vst.msk [vmem:[%s2681_s18 + $0x35] sm:$0x1] %vm1558_vm12, %v1740_v16 }
 0x6c1   : > { %v1742_v32 = vpop.permute.xlu1 %1741 }
 0x6c2   : > { %1758 = vst.msk [vmem:[%s2681_s18 + $0x3d] sm:$0x1] %vm1558_vm12, %v1742_v32 }
 0x6c3   : > { %v1772_v30 = vpop.permute.xlu0 %1771 }
 0x6c4   : > { %1789 = vst.msk [vmem:[%s2681_s18 + $0x36] sm:$0x1] %vm1558_vm12, %v1772_v30 }
 0x6c5   : > { %v1774_v14 = vpop.permute.xlu1 %1773 }
 0x6c6   : > { %1790 = vst.msk [vmem:[%s2681_s18 + $0x3e] sm:$0x1] %vm1558_vm12, %v1774_v14 }
 0x6c7   : > { %v1804_v46 = vpop.permute.xlu0 %1803 }
 0x6c8   : > { %1821 = vst.msk [vmem:[%s2681_s18 + $0x37] sm:$0x1] %vm1558_vm12, %v1804_v46 }
 0x6c9   : > { %v1806_v31 = vpop.permute.xlu1 %1805 }
 0x6ca   : > { %1822 = vst.msk [vmem:[%s2681_s18 + $0x3f] sm:$0x1] %vm1558_vm12, %v1806_v31 }
 0x6cb   : > { %2180 = shalt.err (!%p2177_p3)
}
 0x6cc   : > { %s2181_s14 = scalar_lea.hbm %s2877_s11, 1024  ;;  %s2185_s28 = scalar_lea.hbm %s2934_s6, 2048 }
 0x6cd   : > { %p2182_p4 = scmp.ne.s32.totalorder %s2877_s11, %s2181_s14  ;;  %p2186_p9 = scmp.lt.u32.totalorder %s2877_s11, %s2934_s6 }
 0x6ce   : > { %p2187_p10 = scmp.lt.u32.totalorder %s2185_s28, %s2181_s14  ;;  %p2189_p12 = scmp.lt.u32.totalorder %s2181_s14, %s2877_s11 }
 0x6cf   : > { %p2183_p7 = pnand %p2182_p4, %p2335_p5 }
 0x6d0   : > { %p2188_p11 = por %p2187_p10, %p2186_p9 }
 0x6d1   : > { %p2184_p8 = pneg %p2183_p7 }
 0x6d2   : > { %p2190_p13 = por %p2189_p12, %p2188_p11 }
 0x6d4   : > { %p2191_p0 = pnand %p2190_p13, %p2184_p8 }
 0x6d6   : > { %2194 = shalt.err (!%p2191_p0)
}
 0x6d7   : > { %s2260_s16 = smov 128   ;;  %s2261_s10 = smov 8  }
 0x6d8   : > { %2096 = dma.vmem_to_hbm [thread:$0]  (%p2335_p5), %s2879_s17, 1024, %s2877_s11, %s2887_s25, %s2260_s16, %s2260_s16, %s2261_s10  }
 0x6d9 PF: > { %p2102_p1 = scmp.ge.s32.totalorder %s2229_s24, 2  ;;  %s1852_s20 = sand.u32 1, %s2217_s21  }
 0x6da   : > { %s1853_s12 = scalar_lea.sflag [#allocation7], %s1852_s20 }
 0x6db   : > { %p2099_p2 = pnand %p2102_p1, %p2339_p6 }
 0x6dd   : > { %2212 = dma.done.wait (!%p2099_p2), %s1853_s12, 1024  }
 0x6de   : > { %2214 = vsyncadd (!%p2099_p2), %s1853_s12, 4294966272  ;;  %p16_p3 = scmp.ge.s32.totalorder %s2322_s27, 4   ;;  %s2937_s21 = smov %s2221_s22 }
 0x6df   : > { %s2938_s22 = smov %s2225_s23  ;;  %s2939_s23 = smov %s2333_s30 }
 0x6e0   : > { %s2940_s24 = smov %s2322_s27  ;;  %18 = sbr.rel (!%p16_p3) target bundleno = 3 (0x3), region = 79 }
 0x6e7   :  { %1858 = vsyncpa [#allocation7], 1 }
 0x6e8   :  { %1860 = vsyncpa [#allocation7 + $0x1], 1 }

</bundles_post_ra>
